<compile_context>
chip_gen: v6e
topology: v6e:2x2x1
jax: 0.10.0
libtpu: 0.0.40
codegen_flags: <defaults>
</compile_context>

<pallas_src>
import functools

import jax
import jax.numpy as jnp
from jax.experimental import pallas as pl
from jax.experimental.pallas import tpu as pltpu


def _fused_layers_kernel(x_ref, gamma_ref, beta_ref,
                         wqkv_ref, bqkv_ref, wo_ref, bo_ref,
                         out_x_ref, out_attn_ref,
                         *, heads, dim_head):
    """One grid step = one (batch tile, layer).

    The activation is carried across the depth (last, 'arbitrary') grid axis in
    out_x_ref, whose block index is constant along that axis (resident output /
    accumulator pattern)."""
    layer = pl.program_id(1)

    # Seed the resident activation with the kernel input at layer 0.
    @pl.when(layer == 0)
    def _():
        out_x_ref[...] = x_ref[...]

    x = out_x_ref[...]                               # (Bb, N, D), f32, VMEM-resident
    Bb, N, D = x.shape
    Hdk = heads * dim_head
    x2 = x.reshape(Bb * N, D)                        # fold batch into sublanes

    # ---- LayerNorm (eps=1e-5, affine); keep all VPU/EUP math in f32 -------
    mean = jnp.mean(x2, axis=-1, keepdims=True)
    var = jnp.mean((x2 - mean) ** 2, axis=-1, keepdims=True)
    inv = jax.lax.rsqrt(var + 1e-5)
    normed = (x2 - mean) * inv * gamma_ref[0] + beta_ref[0]        # (Bb*N, D)

    # ---- fused QKV projection: ONE MXU matmul, bf16 operands, f32 acc -----
    qkv = jnp.dot(normed.astype(jnp.bfloat16), wqkv_ref[0],
                  preferred_element_type=jnp.float32) + bqkv_ref[0]  # (Bb*N, 3*Hdk)

    def heads_view(i):
        h = qkv[:, i * Hdk:(i + 1) * Hdk]            # (Bb*N, Hdk)
        h = h.reshape(Bb, N, heads, dim_head)
        h = jnp.transpose(h, (0, 2, 1, 3))           # (Bb, H, N, dk)
        return h.reshape(Bb * heads, N, dim_head)    # single batch dim for einsum

    q, k, v = heads_view(0), heads_view(1), heads_view(2)

    # ---- head-batched attention (no per-head loop, no explicit k.T) -------
    scale = 1.0 / (dim_head ** 0.5)
    scores = jnp.einsum('znd,zmd->znm',
                        q.astype(jnp.bfloat16), k.astype(jnp.bfloat16),
                        preferred_element_type=jnp.float32) * scale   # (Bb*H, N, N)
    scores = scores - jnp.max(scores, axis=-1, keepdims=True)
    e = jnp.exp(scores)
    attn = e * pl.reciprocal(jnp.sum(e, axis=-1, keepdims=True), approx=True)

    # Single store of the whole attention slab for this (batch tile, layer).
    out_attn_ref[0] = attn.reshape(Bb, heads, N, N)

    ctx = jnp.einsum('znm,zmd->znd',
                     attn.astype(jnp.bfloat16), v.astype(jnp.bfloat16),
                     preferred_element_type=jnp.float32)              # (Bb*H, N, dk)
    ctx = jnp.transpose(ctx.reshape(Bb, heads, N, dim_head), (0, 2, 1, 3))
    ctx = ctx.reshape(Bb * N, Hdk)

    # ---- output projection + residual --------------------------------------
    proj = jnp.dot(ctx.astype(jnp.bfloat16), wo_ref[0],
                   preferred_element_type=jnp.float32) + bo_ref[0]    # (Bb*N, D)
    out_x_ref[...] = (proj + x2).reshape(Bb, N, D)


def transformer_only_att(x, layer_params, *, heads, dim_head, batch_block=None):
    """Forward of Transformer_only_Att: returns (x, [attn_matrix per layer])."""
    B, N, D = x.shape
    depth = len(layer_params)
    Hdk = heads * dim_head

    # All of B fits in one block at these sizes (fewest grid steps, best sublane
    # utilization on the single TC of v5e/v6e).  On v7x (2 TensorCores) pass
    # batch_block = B // 2 so the leading 'parallel' grid axis feeds both cores.
    if batch_block is None:
        batch_block = B
    assert B % batch_block == 0
    b_tiles = B // batch_block

    # Stack per-layer params along a leading depth axis; fuse Q/K/V weights so
    # the projection is a single matmul; weights go to bf16 for the MXU.
    stack = lambda name: jnp.stack([p[name] for p in layer_params], axis=0)
    gamma = stack("gamma")                                            # (depth, 1, D) f32
    beta = stack("beta")                                              # (depth, 1, D) f32
    wqkv = jnp.concatenate([stack("wq"), stack("wk"), stack("wv")],
                           axis=-1).astype(jnp.bfloat16)              # (depth, D, 3*Hdk)
    bqkv = jnp.concatenate([stack("bq"), stack("bk"), stack("bv")],
                           axis=-1)                                   # (depth, 1, 3*Hdk) f32
    wo = stack("wo").astype(jnp.bfloat16)                             # (depth, Hdk, D)
    bo = stack("bo")                                                  # (depth, 1, D) f32

    kernel = functools.partial(_fused_layers_kernel, heads=heads, dim_head=dim_head)

    def per_layer(shape):
        # one layer's slice of a depth-stacked parameter
        return pl.BlockSpec((1,) + shape[1:],
                            lambda b, l: (l,) + (0,) * (len(shape) - 1))

    out_x, out_attn = pl.pallas_call(
        kernel,
        out_shape=(
            jax.ShapeDtypeStruct((B, N, D), jnp.float32),
            jax.ShapeDtypeStruct((depth, B, heads, N, N), jnp.float32),
        ),
        grid_spec=pltpu.PrefetchScalarGridSpec(
            num_scalar_prefetch=0,
            grid=(b_tiles, depth),                 # depth innermost: x carried across it
            in_specs=[
                pl.BlockSpec((batch_block, N, D), lambda b, l: (b, 0, 0)),  # x
                per_layer(gamma.shape),            # ln gamma
                per_layer(beta.shape),             # ln beta
                per_layer(wqkv.shape),             # fused Wqkv
                per_layer(bqkv.shape),             # fused bqkv
                per_layer(wo.shape),               # Wo
                per_layer(bo.shape),               # bo
            ],
            out_specs=[
                pl.BlockSpec((batch_block, N, D), lambda b, l: (b, 0, 0)),
                pl.BlockSpec((1, batch_block, heads, N, N),
                             lambda b, l: (l, b, 0, 0, 0)),
            ],
        ),
        compiler_params=pltpu.CompilerParams(
            dimension_semantics=("parallel", "arbitrary")),
    )(x, gamma, beta, wqkv, bqkv, wo, bo)

    attn_weights = [out_attn[i] for i in range(depth)]
    return out_x, attn_weights


def init_params(key, depth, dim, heads, dim_head):
    """Deterministic parameter init matching the module's shapes."""
    Hdk = heads * dim_head
    layers = []
    for _ in range(depth):
        key, *ks = jax.random.split(key, 9)
        layers.append({
            "gamma": jnp.ones((1, dim), jnp.float32),
            "beta": jnp.zeros((1, dim), jnp.float32),
            "wq": 0.02 * jax.random.normal(ks[0], (dim, Hdk), jnp.float32),
            "bq": 0.02 * jax.random.normal(ks[1], (1, Hdk), jnp.float32),
            "wk": 0.02 * jax.random.normal(ks[2], (dim, Hdk), jnp.float32),
            "bk": 0.02 * jax.random.normal(ks[3], (1, Hdk), jnp.float32),
            "wv": 0.02 * jax.random.normal(ks[4], (dim, Hdk), jnp.float32),
            "bv": 0.02 * jax.random.normal(ks[5], (1, Hdk), jnp.float32),
            "wo": 0.02 * jax.random.normal(ks[6], (Hdk, dim), jnp.float32),
            "bo": 0.02 * jax.random.normal(ks[7], (1, dim), jnp.float32),
        })
    return layers


if __name__ == "__main__":
    # small shapes: batch=2, seq=8, dim=32, depth=2, heads=4, dim_head=8
    B, N, D = 2, 8, 32
    depth, heads, dim_head = 2, 4, 8

    key = jax.random.PRNGKey(0)
    kx, kp = jax.random.split(key)
    x = jax.random.normal(kx, (B, N, D), jnp.float32)
    params = init_params(kp, depth, D, heads, dim_head)

    out, attn_weights = transformer_only_att(x, params, heads=heads, dim_head=dim_head)
    out = jax.block_until_ready(out)
    for a in attn_weights:
        jax.block_until_ready(a)

    assert out.shape == (B, N, D)
    assert len(attn_weights) == depth
    assert attn_weights[0].shape == (B, heads, N, N)
    # softmax rows should sum to ~1 (approx reciprocal -> loose tolerance)
    row_sums = jnp.sum(attn_weights[0], axis=-1)
    assert bool(jnp.all(jnp.abs(row_sums - 1.0) < 1e-2))
    print("KERNEL_OK")
</pallas_src>

<mosaic_0001>
module attributes {stable_mosaic.version = 11 : i64} {
  func.func @_fused_layers_kernel(%arg0: i32, %arg1: i32, %arg2: memref<2x8x32xf32, #tpu.memory_space<vmem>>, %arg3: memref<1x1x32xf32, #tpu.memory_space<vmem>>, %arg4: memref<1x1x32xf32, #tpu.memory_space<vmem>>, %arg5: memref<1x32x96xbf16, #tpu.memory_space<vmem>>, %arg6: memref<1x1x96xf32, #tpu.memory_space<vmem>>, %arg7: memref<1x32x32xbf16, #tpu.memory_space<vmem>>, %arg8: memref<1x1x32xf32, #tpu.memory_space<vmem>>, %arg9: memref<2x8x32xf32, #tpu.memory_space<vmem>>, %arg10: memref<1x2x4x8x8xf32, #tpu.memory_space<vmem>>) attributes {dimension_semantics = [#tpu.dimension_semantics<parallel>, #tpu.dimension_semantics<arbitrary>], iteration_bounds = array<i64: 1, 2>, scalar_prefetch = 0 : i64, scratch_operands = 0 : i64, tpu.core_type = #tpu.core_type<tc>, window_params = [{transform_indices = @transform_0, window_bounds = array<i64: 2, 8, 32>}, {transform_indices = @transform_1, window_bounds = array<i64: 1, 1, 32>}, {transform_indices = @transform_2, window_bounds = array<i64: 1, 1, 32>}, {transform_indices = @transform_3, window_bounds = array<i64: 1, 32, 96>}, {transform_indices = @transform_4, window_bounds = array<i64: 1, 1, 96>}, {transform_indices = @transform_5, window_bounds = array<i64: 1, 32, 32>}, {transform_indices = @transform_6, window_bounds = array<i64: 1, 1, 32>}, {transform_indices = @transform_7, window_bounds = array<i64: 2, 8, 32>}, {transform_indices = @transform_8, window_bounds = array<i64: 1, 2, 4, 8, 8>}]} {
    %c0_i32 = arith.constant 0 : i32
    %0 = arith.cmpi eq, %arg1, %c0_i32 : i32
    %1 = arith.extui %0 : i1 to i32
    %c0_i32_0 = arith.constant 0 : i32
    %2 = arith.cmpi ne, %1, %c0_i32_0 : i32
    scf.if %2 {
      %c0_40 = arith.constant 0 : index
      %c0_41 = arith.constant 0 : index
      %c0_42 = arith.constant 0 : index
      %87 = vector.load %arg2[%c0_40, %c0_41, %c0_42] : memref<2x8x32xf32, #tpu.memory_space<vmem>>, vector<2x8x32xf32>
      %c0_43 = arith.constant 0 : index
      %c0_44 = arith.constant 0 : index
      %c0_45 = arith.constant 0 : index
      %88 = vector.load %arg9[%c0_43, %c0_44, %c0_45] : memref<2x8x32xf32, #tpu.memory_space<vmem>>, vector<2x8x32xf32>
      tpu.vector_store %arg9[%c0_43, %c0_44, %c0_45], %87 {strides = array<i32>} : memref<2x8x32xf32, #tpu.memory_space<vmem>>, vector<2x8x32xf32>,
    } else {
    }
    %c0 = arith.constant 0 : index
    %c0_1 = arith.constant 0 : index
    %c0_2 = arith.constant 0 : index
    %3 = vector.load %arg9[%c0, %c0_1, %c0_2] : memref<2x8x32xf32, #tpu.memory_space<vmem>>, vector<2x8x32xf32>
    %4 = vector.shape_cast %3 : vector<2x8x32xf32> to vector<16x32xf32>
    %cst = arith.constant dense<0.000000e+00> : vector<16xf32>
    %5 = vector.multi_reduction <add>, %4, %cst [1] : vector<16x32xf32> to vector<16xf32>
    %6 = vector.shape_cast %5 : vector<16xf32> to vector<16x1xf32>
    %cst_3 = arith.constant 3.200000e+01 : f32
    %7 = vector.broadcast %cst_3 : f32 to vector<16x1xf32>
    %8 = arith.divf %6, %7 : vector<16x1xf32>
    %9 = vector.broadcast %8 : vector<16x1xf32> to vector<16x32xf32>
    %10 = arith.subf %4, %9 : vector<16x32xf32>
    %11 = arith.mulf %10, %10 : vector<16x32xf32>
    %cst_4 = arith.constant dense<0.000000e+00> : vector<16xf32>
    %12 = vector.multi_reduction <add>, %11, %cst_4 [1] : vector<16x32xf32> to vector<16xf32>
    %13 = vector.shape_cast %12 : vector<16xf32> to vector<16x1xf32>
    %cst_5 = arith.constant 3.200000e+01 : f32
    %14 = vector.broadcast %cst_5 : f32 to vector<16x1xf32>
    %15 = arith.divf %13, %14 : vector<16x1xf32>
    %cst_6 = arith.constant 9.99999974E-6 : f32
    %16 = vector.broadcast %cst_6 : f32 to vector<16x1xf32>
    %17 = arith.addf %15, %16 : vector<16x1xf32>
    %18 = math.rsqrt %17 : vector<16x1xf32>
    %19 = vector.broadcast %8 : vector<16x1xf32> to vector<16x32xf32>
    %20 = arith.subf %4, %19 : vector<16x32xf32>
    %21 = vector.broadcast %18 : vector<16x1xf32> to vector<16x32xf32>
    %22 = arith.mulf %20, %21 : vector<16x32xf32>
    %c0_7 = arith.constant 0 : index
    %c0_8 = arith.constant 0 : index
    %c0_9 = arith.constant 0 : index
    %23 = vector.load %arg3[%c0_7, %c0_8, %c0_9] : memref<1x1x32xf32, #tpu.memory_space<vmem>>, vector<1x1x32xf32>
    %24 = vector.shape_cast %23 : vector<1x1x32xf32> to vector<1x32xf32>
    %25 = vector.broadcast %24 : vector<1x32xf32> to vector<16x32xf32>
    %26 = arith.mulf %22, %25 : vector<16x32xf32>
    %c0_10 = arith.constant 0 : index
    %c0_11 = arith.constant 0 : index
    %c0_12 = arith.constant 0 : index
    %27 = vector.load %arg4[%c0_10, %c0_11, %c0_12] : memref<1x1x32xf32, #tpu.memory_space<vmem>>, vector<1x1x32xf32>
    %28 = vector.shape_cast %27 : vector<1x1x32xf32> to vector<1x32xf32>
    %29 = vector.broadcast %28 : vector<1x32xf32> to vector<16x32xf32>
    %30 = arith.addf %26, %29 : vector<16x32xf32>
    %31 = arith.truncf %30 : vector<16x32xf32> to vector<16x32xbf16>
    %c0_13 = arith.constant 0 : index
    %c0_14 = arith.constant 0 : index
    %c0_15 = arith.constant 0 : index
    %32 = vector.load %arg5[%c0_13, %c0_14, %c0_15] : memref<1x32x96xbf16, #tpu.memory_space<vmem>>, vector<1x32x96xbf16>
    %33 = vector.shape_cast %32 : vector<1x32x96xbf16> to vector<32x96xbf16>
    %cst_16 = arith.constant dense<0.000000e+00> : vector<16x96xf32>
    %34 = tpu.matmul %31, %33, %cst_16 {dimension_numbers = #tpu.dot_dimension_numbers<[1], [0], [0], [1], [0, 0, 1, 1], [], []>} : vector<16x32xbf16>, vector<32x96xbf16>, vector<16x96xf32> -> vector<16x96xf32>
    %c0_17 = arith.constant 0 : index
    %c0_18 = arith.constant 0 : index
    %c0_19 = arith.constant 0 : index
    %35 = vector.load %arg6[%c0_17, %c0_18, %c0_19] : memref<1x1x96xf32, #tpu.memory_space<vmem>>, vector<1x1x96xf32>
    %36 = vector.shape_cast %35 : vector<1x1x96xf32> to vector<1x96xf32>
    %37 = vector.broadcast %36 : vector<1x96xf32> to vector<16x96xf32>
    %38 = arith.addf %34, %37 : vector<16x96xf32>
    %39 = vector.extract_strided_slice %38 {offsets = [0, 0], sizes = [16, 32], strides = [1, 1]} : vector<16x96xf32> to vector<16x32xf32>
    %40 = vector.shape_cast %39 : vector<16x32xf32> to vector<2x8x4x8xf32>
    %41 = tpu.transpose %40, [0, 2, 1, 3] : vector<2x8x4x8xf32> -> vector<2x4x8x8xf32>
    %42 = vector.shape_cast %41 : vector<2x4x8x8xf32> to vector<8x8x8xf32>
    %43 = vector.extract_strided_slice %38 {offsets = [0, 32], sizes = [16, 32], strides = [1, 1]} : vector<16x96xf32> to vector<16x32xf32>
    %44 = vector.shape_cast %43 : vector<16x32xf32> to vector<2x8x4x8xf32>
    %45 = tpu.transpose %44, [0, 2, 1, 3] : vector<2x8x4x8xf32> -> vector<2x4x8x8xf32>
    %46 = vector.shape_cast %45 : vector<2x4x8x8xf32> to vector<8x8x8xf32>
    %47 = vector.extract_strided_slice %38 {offsets = [0, 64], sizes = [16, 32], strides = [1, 1]} : vector<16x96xf32> to vector<16x32xf32>
    %48 = vector.shape_cast %47 : vector<16x32xf32> to vector<2x8x4x8xf32>
    %49 = tpu.transpose %48, [0, 2, 1, 3] : vector<2x8x4x8xf32> -> vector<2x4x8x8xf32>
    %50 = vector.shape_cast %49 : vector<2x4x8x8xf32> to vector<8x8x8xf32>
    %51 = arith.truncf %42 : vector<8x8x8xf32> to vector<8x8x8xbf16>
    %52 = arith.truncf %46 : vector<8x8x8xf32> to vector<8x8x8xbf16>
    "tpu.trace_start"() <{level = 10 : i32, message = "znd,zmd->znm"}> : () -> ()
    %cst_20 = arith.constant dense<0.000000e+00> : vector<8x8x8xf32>
    %53 = tpu.matmul %51, %52, %cst_20 {dimension_numbers = #tpu.dot_dimension_numbers<[2], [2], [1], [1], [0, 0, 0, 1, 1, 1], [0], [0]>} : vector<8x8x8xbf16>, vector<8x8x8xbf16>, vector<8x8x8xf32> -> vector<8x8x8xf32>
    "tpu.trace_stop"() : () -> ()
    %cst_21 = arith.constant 0.353553385 : f32
    %54 = vector.broadcast %cst_21 : f32 to vector<8x8x8xf32>
    %55 = arith.mulf %53, %54 : vector<8x8x8xf32>
    %cst_22 = arith.constant dense<0xFF800000> : vector<8x8xf32>
    %56 = vector.multi_reduction <maximumf>, %55, %cst_22 [2] : vector<8x8x8xf32> to vector<8x8xf32>
    %57 = vector.shape_cast %56 : vector<8x8xf32> to vector<8x8x1xf32>
    %58 = vector.broadcast %57 : vector<8x8x1xf32> to vector<8x8x8xf32>
    %59 = arith.subf %55, %58 : vector<8x8x8xf32>
    %60 = math.exp %59 : vector<8x8x8xf32>
    %cst_23 = arith.constant dense<0.000000e+00> : vector<8x8xf32>
    %61 = vector.multi_reduction <add>, %60, %cst_23 [2] : vector<8x8x8xf32> to vector<8x8xf32>
    %62 = vector.shape_cast %61 : vector<8x8xf32> to vector<8x8x1xf32>
    %63 = tpu.reciprocal %62 {approx = true} : vector<8x8x1xf32> -> vector<8x8x1xf32>
    %64 = vector.broadcast %63 : vector<8x8x1xf32> to vector<8x8x8xf32>
    %65 = arith.mulf %60, %64 : vector<8x8x8xf32>
    %66 = vector.shape_cast %65 : vector<8x8x8xf32> to vector<2x4x8x8xf32>
    %c0_24 = arith.constant 0 : index
    %c0_25 = arith.constant 0 : index
    %c0_26 = arith.constant 0 : index
    %c0_27 = arith.constant 0 : index
    %c0_28 = arith.constant 0 : index
    %67 = vector.load %arg10[%c0_24, %c0_25, %c0_26, %c0_27, %c0_28] : memref<1x2x4x8x8xf32, #tpu.memory_space<vmem>>, vector<1x2x4x8x8xf32>
    %68 = vector.shape_cast %67 : vector<1x2x4x8x8xf32> to vector<2x4x8x8xf32>
    %69 = vector.shape_cast %66 : vector<2x4x8x8xf32> to vector<1x2x4x8x8xf32>
    tpu.vector_store %arg10[%c0_24, %c0_25, %c0_26, %c0_27, %c0_28], %69 {strides = array<i32>} : memref<1x2x4x8x8xf32, #tpu.memory_space<vmem>>, vector<1x2x4x8x8xf32>,
    %70 = arith.truncf %65 : vector<8x8x8xf32> to vector<8x8x8xbf16>
    %71 = arith.truncf %50 : vector<8x8x8xf32> to vector<8x8x8xbf16>
    "tpu.trace_start"() <{level = 10 : i32, message = "znm,zmd->znd"}> : () -> ()
    %cst_29 = arith.constant dense<0.000000e+00> : vector<8x8x8xf32>
    %72 = tpu.matmul %70, %71, %cst_29 {dimension_numbers = #tpu.dot_dimension_numbers<[2], [1], [1], [2], [0, 0, 0, 1, 1, 2], [0], [0]>} : vector<8x8x8xbf16>, vector<8x8x8xbf16>, vector<8x8x8xf32> -> vector<8x8x8xf32>
    "tpu.trace_stop"() : () -> ()
    %73 = vector.shape_cast %72 : vector<8x8x8xf32> to vector<2x4x8x8xf32>
    %74 = tpu.transpose %73, [0, 2, 1, 3] : vector<2x4x8x8xf32> -> vector<2x8x4x8xf32>
    %75 = vector.shape_cast %74 : vector<2x8x4x8xf32> to vector<16x32xf32>
    %76 = arith.truncf %75 : vector<16x32xf32> to vector<16x32xbf16>
    %c0_30 = arith.constant 0 : index
    %c0_31 = arith.constant 0 : index
    %c0_32 = arith.constant 0 : index
    %77 = vector.load %arg7[%c0_30, %c0_31, %c0_32] : memref<1x32x32xbf16, #tpu.memory_space<vmem>>, vector<1x32x32xbf16>
    %78 = vector.shape_cast %77 : vector<1x32x32xbf16> to vector<32x32xbf16>
    %cst_33 = arith.constant dense<0.000000e+00> : vector<16x32xf32>
    %79 = tpu.matmul %76, %78, %cst_33 {dimension_numbers = #tpu.dot_dimension_numbers<[1], [0], [0], [1], [0, 0, 1, 1], [], []>} : vector<16x32xbf16>, vector<32x32xbf16>, vector<16x32xf32> -> vector<16x32xf32>
    %c0_34 = arith.constant 0 : index
    %c0_35 = arith.constant 0 : index
    %c0_36 = arith.constant 0 : index
    %80 = vector.load %arg8[%c0_34, %c0_35, %c0_36] : memref<1x1x32xf32, #tpu.memory_space<vmem>>, vector<1x1x32xf32>
    %81 = vector.shape_cast %80 : vector<1x1x32xf32> to vector<1x32xf32>
    %82 = vector.broadcast %81 : vector<1x32xf32> to vector<16x32xf32>
    %83 = arith.addf %79, %82 : vector<16x32xf32>
    %84 = arith.addf %83, %4 : vector<16x32xf32>
    %85 = vector.shape_cast %84 : vector<16x32xf32> to vector<2x8x32xf32>
    %c0_37 = arith.constant 0 : index
    %c0_38 = arith.constant 0 : index
    %c0_39 = arith.constant 0 : index
    %86 = vector.load %arg9[%c0_37, %c0_38, %c0_39] : memref<2x8x32xf32, #tpu.memory_space<vmem>>, vector<2x8x32xf32>
    tpu.vector_store %arg9[%c0_37, %c0_38, %c0_39], %85 {strides = array<i32>} : memref<2x8x32xf32, #tpu.memory_space<vmem>>, vector<2x8x32xf32>,
    return
  }
  func.func @transform_0(%arg0: i32, %arg1: i32) -> (i32, i32, i32) {
    %c0_i32 = arith.constant 0 : i32
    %c0_i32_0 = arith.constant 0 : i32
    %c0_i32_1 = arith.constant 0 : i32
    return %arg0, %c0_i32, %c0_i32_0 : i32, i32, i32
  }
  func.func @transform_1(%arg0: i32, %arg1: i32) -> (i32, i32, i32) {
    %c0_i32 = arith.constant 0 : i32
    %c0_i32_0 = arith.constant 0 : i32
    %c0_i32_1 = arith.constant 0 : i32
    return %arg1, %c0_i32, %c0_i32_0 : i32, i32, i32
  }
  func.func @transform_2(%arg0: i32, %arg1: i32) -> (i32, i32, i32) {
    %c0_i32 = arith.constant 0 : i32
    %c0_i32_0 = arith.constant 0 : i32
    %c0_i32_1 = arith.constant 0 : i32
    return %arg1, %c0_i32, %c0_i32_0 : i32, i32, i32
  }
  func.func @transform_3(%arg0: i32, %arg1: i32) -> (i32, i32, i32) {
    %c0_i32 = arith.constant 0 : i32
    %c0_i32_0 = arith.constant 0 : i32
    %c0_i32_1 = arith.constant 0 : i32
    return %arg1, %c0_i32, %c0_i32_0 : i32, i32, i32
  }
  func.func @transform_4(%arg0: i32, %arg1: i32) -> (i32, i32, i32) {
    %c0_i32 = arith.constant 0 : i32
    %c0_i32_0 = arith.constant 0 : i32
    %c0_i32_1 = arith.constant 0 : i32
    return %arg1, %c0_i32, %c0_i32_0 : i32, i32, i32
  }
  func.func @transform_5(%arg0: i32, %arg1: i32) -> (i32, i32, i32) {
    %c0_i32 = arith.constant 0 : i32
    %c0_i32_0 = arith.constant 0 : i32
    %c0_i32_1 = arith.constant 0 : i32
    return %arg1, %c0_i32, %c0_i32_0 : i32, i32, i32
  }
  func.func @transform_6(%arg0: i32, %arg1: i32) -> (i32, i32, i32) {
    %c0_i32 = arith.constant 0 : i32
    %c0_i32_0 = arith.constant 0 : i32
    %c0_i32_1 = arith.constant 0 : i32
    return %arg1, %c0_i32, %c0_i32_0 : i32, i32, i32
  }
  func.func @transform_7(%arg0: i32, %arg1: i32) -> (i32, i32, i32) {
    %c0_i32 = arith.constant 0 : i32
    %c0_i32_0 = arith.constant 0 : i32
    %c0_i32_1 = arith.constant 0 : i32
    return %arg0, %c0_i32, %c0_i32_0 : i32, i32, i32
  }
  func.func @transform_8(%arg0: i32, %arg1: i32) -> (i32, i32, i32, i32, i32) {
    %c0_i32 = arith.constant 0 : i32
    %c0_i32_0 = arith.constant 0 : i32
    %c0_i32_1 = arith.constant 0 : i32
    %c0_i32_2 = arith.constant 0 : i32
    return %arg1, %arg0, %c0_i32, %c0_i32_0, %c0_i32_1 : i32, i32, i32, i32, i32
  }
}

</mosaic_0001>

<bundles_post_ra>
// kernel: tpu_custom_call.1
= control target key start
LH: loop header
LB: loop body
LE: loop exit
PB: predicated region body
PF: predicated region fallthrough
CT: control target
= control target key end

     0   :  { %s4363_s0 = inlined_call_operand.hbm [shape: f32[2,8,32], index: 0, kind: input, shape index: {}]   ;;  %s4364_s1 = inlined_call_operand.hbm [shape: f32[2,1,32], index: 1, kind: input, shape index: {}]   ;;  %s4365_s2 = inlined_call_operand.vmem [shape: f32[2,1,32], index: 2, kind: input, shape index: {}]   ;;  %s4366_s3 = inlined_call_operand.hbm [shape: bf16[2,32,96], index: 3, kind: input, shape index: {}]   ;;  %s4367_s4 = inlined_call_operand.vmem [shape: f32[2,1,96], index: 4, kind: input, shape index: {}]   ;;  %s4368_s5 = inlined_call_operand.hbm [shape: bf16[2,32,32], index: 5, kind: input, shape index: {}]   ;;  %s4369_s6 = inlined_call_operand.vmem [shape: f32[2,1,32], index: 6, kind: input, shape index: {}]   ;;  %s4370_s7 = inlined_call_operand.hbm [shape: f32[2,8,32], index: 7, kind: output, shape index: {0}]   ;;  %s4371_s8 = inlined_call_operand.hbm [shape: f32[2,2,4,8,8], index: 8, kind: output, shape index: {1}]  }
   0x1   :  { %4383 = sst [smem:[#allocation24_spill]] %s4364_s1 }
   0x2   :  { %4384 = sst [smem:[#allocation25_spill]] %s4366_s3 }
   0x3   :  { %4385 = sst [smem:[#allocation26_spill]] %s4370_s7 }
   0x4   :  { %14 = vsyncpa [#allocation3], 0 }
   0x5   :  { %15 = vsyncpa [#allocation6], 0 }
   0x6   :  { %17 = vsyncpa [#allocation6 + $0x1], 0 }
   0x7   :  { %18 = vsyncpa [#allocation9], 0 }
   0x8   :  { %20 = vsyncpa [#allocation9 + $0x1], 0 }
   0x9   :  { %21 = vsyncpa [#allocation4], 0 }
   0xa   :  { %22 = vsyncpa [#allocation12], 0 }
   0xb   :  { %24 = vsyncpa [#allocation12 + $0x1], 0  ;;  %s3634_s27 = smov 0   ;;  %s3636_s28 = smov 0  }
   0xc   :  { %s3638_s29 = smov 0   ;;  %s3640_s30 = smov 0  }
   0xd   :  { %s3642_s9 = smov 0   ;;  %s3644_s10 = smov 0  }
   0xe LB: > { %4386 = sst [smem:[#allocation18_spill]] %s3544_s27  ;;  %s39_s11 = sadd.s32 1, %s3560_s9  ;;  %s3564_s10 = sphi %s3644_s10, %s30_s10   ;;  %s3560_s9 = sphi %s3642_s9, %s4420_s9   ;;  %s3556_s30 = sphi %s3640_s30, %s4419_s30   ;;  %s3552_s29 = sphi %s3638_s29, %s4415_s29   ;;  %s3548_s28 = sphi %s3636_s28, %s4418_s28   ;;  %s3544_s27 = sphi %s3634_s27, %s4417_s27  }
   0xf   : > { %4387 = sst [smem:[#allocation19_spill]] %s3552_s29  ;;  %s75_s12 = sadd.s32 1, %s3552_s29 }
  0x10   : > { %4388 = sst [smem:[#allocation20_spill]] %s3564_s10  ;;  %p40_p0 = scmp.ge.s32.totalorder %s39_s11, 2 }
  0x11   : > { %p82_p1 = scmp.ne.s32.totalorder %s3552_s29, %s3548_s28  ;;  %p83_p2 = scmp.eq.s32.totalorder %s3564_s10, 0 }
  0x12   : > { %s4422_s11 = smov (%p40_p0, %s39_s11), 0  ;;  %p3209_p5 = scmp.lt.s32.totalorder %s3564_s10, 2 }
  0x13   : > { %4389 = sst [smem:[#allocation21_spill]] %s4422_s11  ;;  %p84_p4 = por %p83_p2, %p82_p1 }
  0x14   : > { %s72_s13 = ssub.s32 %s3560_s9, %s4422_s11  ;;  %s312_s14 = sand.u32 1, %s3564_s10  }
  0x15   : > { %p73_p6 = scmp.eq.s32.totalorder %s72_s13, 0  ;;  %s3680_s15 = sand.u32 1, %s3552_s29  }
  0x16   : > { %s2959_s16 = sshll.u32 %s3560_s9, 4  ;;  %s4391_s1 = sld [smem:[#allocation24_spill]] }
  0x17   : > { %s3684_s17 = scalar_select %p73_p6, %s3552_s29, %s75_s12  }
  0x18   : > { %s315_s21 = scalar_lea.vmem [#allocation5], %s3680_s15  ;;  %p3690_p7 = pnand %p3209_p5, %p84_p4 }
  0x19   : > { %4390 = sst [smem:[#allocation22_spill]] %s3684_s17  ;;  %s322_s22 = sshll.u32 %s315_s21, 4  ;;  %s323_s22 = int_to_ptr.vmem [resolvable:$true] %s322_s22 }
  0x1a   : > { %s4372_s24 = sshll.u32 %s3680_s15, 4  ;;  %s3695_s25 = scalar_lea.sflag [#allocation6], %s312_s14 }
  0x1b   : > { %p3340_p8 = pneg %p3690_p7  ;;  %s3351_s26 = scalar_lea.vmem %s323_s22, 16 }
  0x1c   : > { %s320_s20 = scalar_lea.hbm %s4391_s1, %s2959_s16  ;;  %p3352_p9 = scmp.ne.s32.totalorder %s323_s22, %s3351_s26 }
  0x1d   : > { %s3566_s12 = smov [#allocation5]  }
  0x1e   : > { %p3354_p10 = pnand %p3352_p9, %p3340_p8  ;;  %s3356_s13 = sshll.u32 %s3566_s12, 4  ;;  %s3357_s13 = int_to_ptr.vmem [resolvable:$false] %s3356_s13 }
  0x1f   : > { %s3358_s16 = scalar_lea.vmem %s3357_s13, 32  ;;  %p3359_p12 = scmp.lt.s32.totalorder %s323_s22, %s3357_s13 }
  0x20   : > { %p3355_p11 = pneg %p3354_p10  ;;  %p3360_p13 = scmp.lt.s32.totalorder %s3358_s16, %s3351_s26 }
  0x22   : > { %p3361_p0 = por %p3360_p13, %p3359_p12 }
  0x24   : > { %p3362_p2 = pnand %p3361_p0, %p3355_p11 }
  0x26   : > { %3365 = shalt.err (!%p3362_p2)
}
  0x27   : > { %3197 = dma.hbm_to_vmem [thread:$0]  (!%p3690_p7), %s320_s20, 16, %s323_s22, %s3695_s25  }
  0x28   : > { %s3021_s14 = sshll.u32 %s3560_s9, 8  ;;  %s339_s18 = scalar_lea.vmem [#allocation7], %s4372_s24 }
  0x29   : > { %s346_s19 = sshll.u32 %s339_s18, 4  ;;  %s3711_s21 = sadd.s32 4294967295, %s3564_s10   ;;  %s3708_s19 = int_to_ptr.vmem [resolvable:$true] %s346_s19 }
  0x2a   : > { %s2955_s26 = sadd.s32 4294967294, %s3564_s10   ;;  %p88_p4 = scmp.ne.s32.totalorder %s3548_s28, %s3544_s27 }
  0x2b   : > { %p89_p5 = scmp.eq.s32.totalorder %s3711_s21, 0  ;;  %p4377_p6 = scmp.eq.s32.totalorder %s3711_s21, 1 }
  0x2c   : > { %p276_p9 = scmp.eq.s32.totalorder %s2955_s26, 1  ;;  %p2956_p10 = scmp.ge.s32.totalorder %s3564_s10, 1 }
  0x2d   : > { %p3721_p11 = por %p89_p5, %p88_p4  ;;  %p3730_p12 = por %p4377_p6, %p82_p1 }
  0x2e   : > { %p3734_p13 = por %p276_p9, %p88_p4  ;;  %p283_p0 = scmp.lt.s32.totalorder %s3564_s10, 3 }
  0x2f   : > { %s4394_s22 = scalar_select %p3730_p12, 1, 0 }
  0x30   : > { %s4395_s12 = scalar_select %p3734_p13, 1, 0 }
  0x31   : > { %p3739_p2 = pnand %p2956_p10, %p283_p0  ;;  %s3567_s16 = smov [#allocation2]  }
  0x32   : > { %4396 = sst [smem:[#allocation23_spill]] %s4395_s12  ;;  %s298_s18 = sshll.u32 %s3567_s16, 4  ;;  %s3743_s18 = int_to_ptr.vmem [resolvable:$true] %s298_s18 }
  0x33   : > { %p3190_p1 = pneg %p3739_p2  ;;  %s4398_s3 = sld [smem:[#allocation25_spill]] }
  0x34   : > { %s3379_s17 = scalar_lea.vmem %s3708_s19, 256  ;;  %s3568_s16 = smov [#allocation7]  }
  0x35   : > { %p3754_p4 = pnand %p3190_p1, %p89_p5  ;;  %p3380_p9 = scmp.ne.s32.totalorder %s3708_s19, %s3379_s17 }
  0x36   : > { %s3384_s29 = sshll.u32 %s3568_s16, 4  ;;  %s3385_s29 = int_to_ptr.vmem [resolvable:$false] %s3384_s29 }
  0x37   : > { %p3382_p10 = pnand %p3380_p9, %p3340_p8  ;;  %s3386_s10 = scalar_lea.vmem %s3385_s29, 512 }
  0x38   : > { %p3387_p3 = scmp.lt.s32.totalorder %s3708_s19, %s3385_s29  ;;  %p3388_p6 = scmp.lt.s32.totalorder %s3386_s10, %s3379_s17 }
  0x39   : > { %s345_s1 = scalar_lea.hbm %s4398_s3, %s3021_s14  ;;  %p3383_p0 = pneg %p3382_p10 }
  0x3a   : > { %p3389_p13 = por %p3388_p6, %p3387_p3 }
  0x3c   : > { %p3390_p12 = pnand %p3389_p13, %p3383_p0 }
  0x3e   : > { %3393 = shalt.err (!%p3390_p12)
}
  0x3f   : > { %s4379_s24 = smov 64   ;;  %s4380_s26 = smov 4  }
  0x40   : > { %3200 = dma.hbm_to_vmem [thread:$0]  (!%p3690_p7), %s345_s1, 256, %s3708_s19, %s3695_s25, %s4379_s24, %s4379_s24, %s4380_s26  }
  0x41   : > { %p3396_p1 = pneg %p3754_p4  ;;  %s3405_s29 = scalar_lea.vmem %s3743_s18, 256 }
  0x42   : > { %p3406_p3 = scmp.ne.s32.totalorder %s3743_s18, %s3405_s29  ;;  %p3413_p13 = scmp.lt.s32.totalorder %s3743_s18, %s3743_s18 }
  0x43   : > { %p3414_p9 = scmp.lt.s32.totalorder %s3405_s29, %s3405_s29 }
  0x44   : > { %p3408_p6 = pnand %p3406_p3, %p3396_p1 }
  0x45   : > { %p3415_p10 = por %p3414_p9, %p3413_p13 }
  0x46   : > { %p3409_p12 = pneg %p3408_p6 }
  0x48   : > { %p3416_p0 = pnand %p3415_p10, %p3409_p12 }
  0x4a   : > { %3419 = shalt.err (!%p3416_p0)
}
  0x4b   : > { %s3571_s10 = smov 128   ;;  %s3572_s1 = smov 8  }
  0x4c   : > { %3193 = dma.hbm_to_vmem [thread:$0]  (!%p3754_p4), %s4363_s0, 256, %s3743_s18, [#allocation3], %s3571_s10, %s3571_s10, %s3572_s1  }
  0x4d   : > { %s372_s29 = scalar_lea.hbm %s4368_s5, %s3021_s14  ;;  %s4400_s24 = sshll.u32 %s3680_s15, 4 }
  0x4e   : > { %s366_s26 = scalar_lea.vmem [#allocation8], %s4400_s24  ;;  %s363_s12 = scalar_lea.sflag [#allocation9], %s3680_s15 }
  0x4f   : > { %s373_s3 = sshll.u32 %s366_s26, 4  ;;  %s3573_s11 = smov [#allocation8]   ;;  %s374_s3 = int_to_ptr.vmem [resolvable:$true] %s373_s3 }
  0x50   : > { %s3433_s27 = scalar_lea.vmem %s374_s3, 256  ;;  %s3438_s7 = sshll.u32 %s3573_s11, 4  ;;  %s3439_s7 = int_to_ptr.vmem [resolvable:$false] %s3438_s7 }
  0x51   : > { %p3434_p1 = scmp.ne.s32.totalorder %s374_s3, %s3433_s27  ;;  %s3440_s18 = scalar_lea.vmem %s3439_s7, 512 }
  0x52   : > { %p3441_p4 = scmp.lt.s32.totalorder %s374_s3, %s3439_s7  ;;  %p3442_p12 = scmp.lt.s32.totalorder %s3440_s18, %s3433_s27 }
  0x53   : > { %p3436_p3 = pnand %p3434_p1, %p3340_p8 }
  0x54   : > { %p3443_p13 = por %p3442_p12, %p3441_p4 }
  0x55   : > { %p3437_p6 = pneg %p3436_p3 }
  0x57   : > { %p3444_p9 = pnand %p3443_p13, %p3437_p6 }
  0x59   : > { %3447 = shalt.err (!%p3444_p9)
}
  0x5a   : > { %s4401_s14 = smov 4   ;;  %s4402_s24 = smov 64  }
  0x5b   : > { %3203 = dma.hbm_to_vmem [thread:$0]  (!%p3690_p7), %s372_s29, 256, %s374_s3, %s363_s12, %s4402_s24, %s4402_s24, %s4401_s14  }
  0x5c   : > { %391 = sbr.rel (%p3739_p2) target bundleno = 2025 (0x7e9), region = 48 }
  0x61   : > { %3523 = dma.done.wait (%p89_p5), [#allocation3], 256  }
  0x62   : > { %3525 = vsyncadd (%p89_p5), [#allocation3], 4294967040  ;;  %s397_s7 = sand.u32 1, %s3711_s21   ;;  %s3807_s27 = sand.u32 1, %s3548_s28  }
  0x63   : > { %s398_s15 = scalar_lea.sflag [#allocation6], %s397_s7  ;;  %s400_s23 = scalar_lea.vmem [#allocation5], %s3807_s27 }
  0x64   : > { %3527 = dma.done.wait (%p3721_p11), %s398_s15, 272  }
  0x65   : > { %3529 = vsyncadd (%p3721_p11), %s398_s15, 4294967024  ;;  %s2968_s3 = sshll.u32 %s3807_s27, 4  ;;  %s415_s13 = scalar_lea.sflag [#allocation9], %s3807_s27 }
  0x66   : > { %s3815_s12 = scalar_lea.vmem [#allocation7], %s2968_s3  ;;  %s3818_s26 = scalar_lea.vmem [#allocation8], %s2968_s3 }
  0x67   : > { %3531 = dma.done.wait (%p3721_p11), %s415_s13, 256  }
  0x68   : > { %3533 = vsyncadd (%p3721_p11), %s415_s13, 4294967040  ;;  %s2970_s10 = sshll.u32 %s3807_s27, 6  ;;  %p470_p7 = scmp.lt.s32.totalorder %s3556_s30, 1 }
  0x69   : > { %s3841_s24 = scalar_lea.vmem [#allocation11], %s2970_s10  ;;  %p2971_p8 = scmp.ne.s32.totalorder %s3556_s30, 0 }
  0x6a   : > { %s3827_s1 = scalar_select %p470_p7, %s3556_s30, 1 }
  0x6b   : > { %485 = sbr.rel (%p2971_p8) target bundleno = 114 (0x72), region = 68 }
  0x6c   : > { %s472_s19 = scalar_lea.vmem %s4365_s2, %s3827_s1  ;;  %s475_s11 = scalar_lea.vmem %s4367_s4, %s3827_s1 }
  0x6d   : > { %s478_s14 = scalar_lea.vmem %s4369_s6, %s3827_s1 }
  0x70   : > { %v486_v0 = vld [vmem:[#allocation2] sm:$0xff]  ;;  %vm488_vm0 = vcmask 261120   ;;  %v487_v1 = vld [vmem:[#allocation2 + $0x8] sm:$0xff] }
  0x71   : > { %489 = vst.msk [vmem:[#allocation10] sm:$0xff] %vm488_vm0, %v486_v0  ;;  %490 = vst.msk [vmem:[#allocation10 + $0x8] sm:$0xff] %vm488_vm0, %v487_v1 }
  0x72 PF: > { %vm493_vm1 = vcmask 261120   ;;  %v3296_v16 = vld [vmem:[%s3815_s12 + $0x8] sm:$0xff]   ;;  %v3574_v17 = vmov 0.0   ;;  %vm3575_vm2 = vmmov 0   ;;  %v3297_v18 = vld [vmem:[%s3815_s12] sm:$0xff]   ;;  %s3577_s13 = smov 120   ;;  %v632_v51 = vlaneseq }
  0x73   : > { %3062 = vmatprep.subr.bf16.mxu0 %v3574_v17  ;;  %3066 = vmatprep.mubr.msk.bf16.mxu0 %vm3575_vm2, %v3574_v17  ;;  %v2972_v27 = vld [vmem:[%s400_s23] ss:$0 sm:$0xff]  ;;  %s3576_s23 = smov 112   ;;  %s3578_s10 = smov 104   ;;  %v3580_v49 = vmov 1983009808  }
  0x74   : > { %3063 = vmatpush3.bf16.msra.mxu0 %v3296_v16  ;;  %3070 = vmatprep.subr.bf16.mxu1 %v3574_v17  ;;  %v2973_v31 = vld [vmem:[%s472_s19] ss:$0 sm:$0xff]  ;;  %s3579_s17 = smov 96   ;;  %v630_v50 = vunpack.c.l.s4 %v3580_v49  ;;  %v633_v53 = vshrl.u32 %v632_v51, 7  ;;  %v3581_v54 = vmov 1934713408  }
  0x75   : > { %3064 = vmatprep.subr.bf16.mxu0 %v3574_v17  ;;  %3072 = vmatprep.mubr.msk.bf16.mxu1 %vm3575_vm2, %v3574_v17  ;;  %v2974_v36 = vld [vmem:[%s475_s11] ss:$0 sm:$0xff]  ;;  %v662_v55 = vunpack.c.l.s4 %v3581_v54  ;;  %vm1507_vm3 = vcmask 64512   ;;  %s3582_s25 = smov 64   ;;  %vm1999_vm4 = vcmask 1043456   ;;  %s3583_s19 = smov 16  }
  0x76   : > { %v631_v52 = vunpack.c.0.s8 %v630_v50  ;;  %s3584_s16 = smov 8   ;;  %vm2663_vm5 = vcmask 130048   ;;  %vm2666_vm6 = vcmask 195584   ;;  %s3023_s29 = sshll.u32 %s3556_s30, 10 }
  0x77   : > { %v663_v61 = vunpack.c.0.s8 %v662_v55  ;;  %s2774_s11 = sshll.u32 %s3841_s24, 4  ;;  %s4289_s7 = scalar_lea.hbm %s4371_s8, %s3023_s29  ;;  %s4291_s11 = int_to_ptr.vmem [resolvable:$true] %s2774_s11 }
  0x78   : > { %v491_v2 = vld [vmem:[#allocation10] sm:$0xff]  ;;  %v492_v3 = vld [vmem:[#allocation10 + $0x8] sm:$0xff]  ;;  %3065 = vmatpush3.bf16.msra.mxu0 %v3297_v18  ;;  %v3907_v58 = vsub.s32 %v631_v52, %v633_v53  ;;  %s2742_s15 = scalar_lea.sflag [#allocation12], %s3807_s27  ;;  %s3448_s3 = scalar_lea.vmem %s4291_s11, 1024 }
  0x79   : > { %v494_v4 = vsel %vm493_vm1, %v491_v2, 0.0  ;;  %v497_v5 = vsel %vm493_vm1, %v492_v3, 0.0  ;;  %3076 = vmatprep.subr.bf16.mxu0 %v3574_v17  ;;  %p3449_p5 = scmp.ne.s32.totalorder %s4291_s11, %s3448_s3  ;;  %p4403_p11 = scmp.ne.s32.totalorder %s4394_s22, 0 }
  0x7a   : > { %495 = vadd.xlane.f32.xlu0 %v494_v4  ;;  %s3586_s12 = smov [#allocation11]  }
  0x7b   : > { %p3450_p2 = pnand %p3449_p5, %p4403_p11 }
  0x7d   : > { %p3451_p10 = pneg %p3450_p2 }
  0x7e   : > { %498 = vadd.xlane.f32.xlu0 %v497_v5 }
 0x103   : > { %v496_v6 = vpop.xlane.xlu0 %495 }
 0x104   : > { %v501_v7 = vmul.f32 0.03125, %v496_v6 }
 0x106   : > { %v503_v8 = vsub.f32 %v491_v2, %v501_v7  ;;  %v3917_v2 = vsub.s32 %v663_v61, %v633_v53 }
 0x107   : > { %v499_v9 = vpop.xlane.xlu0 %498 }
 0x108   : > { %v502_v10 = vmul.f32 0.03125, %v499_v9  ;;  %v505_v11 = vmul.f32 %v503_v8, %v503_v8 }
 0x10a   : > { %v504_v12 = vsub.f32 %v492_v3, %v502_v10  ;;  %v507_v13 = vsel %vm493_vm1, %v505_v11, 0.0 }
 0x10b   : > { %508 = vadd.xlane.f32.xlu1 %v507_v13 }
 0x10c   : > { %v506_v14 = vmul.f32 %v504_v12, %v504_v12 }
 0x10e   : > { %v510_v15 = vsel %vm493_vm1, %v506_v14, 0.0 }
 0x10f   : > { %511 = vadd.xlane.f32.xlu1 %v510_v15 }
 0x194   : > { %v509_v19 = vpop.xlane.xlu1 %508 }
 0x195   : > { %v513_v20 = vmul.f32 0.03125, %v509_v19 }
 0x197   : > { %v515_v21 = vadd.f32 1e-05, %v513_v20 }
 0x198   : > { %v512_v22 = vpop.xlane.xlu1 %511 }
 0x199   : > { %3300 = vrsqrt.f32 %v515_v21  ;;  %v514_v23 = vmul.f32 0.03125, %v512_v22 }
 0x19b   : > { %v516_v24 = vadd.f32 1e-05, %v514_v23 }
 0x19d   : > { %3302 = vrsqrt.f32 %v516_v24 }
 0x1a6   : > { %v3301_v25 = vpop.eup %3300 }
 0x1a7   : > { %v519_v26 = vmul.f32 %v3301_v25, %v503_v8 }
 0x1a9   : > { %v528_v30 = vmul.f32 %v2972_v27, %v519_v26 }
 0x1aa   : > { %v3303_v28 = vpop.eup %3302 }
 0x1ab   : > { %v520_v29 = vmul.f32 %v3303_v28, %v504_v12  ;;  %v537_v33 = vadd.f32 %v2973_v31, %v528_v30 }
 0x1ad   : > { %v529_v32 = vmul.f32 %v2972_v27, %v520_v29 }
 0x1af   : > { %v538_v34 = vadd.f32 %v2973_v31, %v529_v32 }
 0x1b1   : > { %v539_v35 = vpack.c.bf16 %v538_v34, %v537_v33 }
 0x1b3   : > { %3067 = vmatmul.mubr.msk.bf16.vlgmr.msra.gmra.mxu0 %vm493_vm1, %v539_v35 }
 0x1b4   : > { %3078 = vmatprep.mubr.msk.bf16.mxu0 %vm3575_vm2, %v3574_v17 }
 0x273   : > { %v600_v37 = vpop.f32.mrf.mxu0 }
 0x274   : > { %v3873_v38 = vadd.f32 %v2974_v36, %v600_v37 }
 0x275   : > { %v3068_v39 = vpop.f32.mrf.mxu0 }
 0x276   : > { %615 = vrot.lane.b32.xlu1 %v3873_v38, %s3576_s23  ;;  %609 = vrot.lane.b32.xlu0 %v3873_v38, %s3577_s13 }
 0x277   : > { %v603_v40 = vpop.f32.mrf.mxu0 }
 0x278   : > { %v3877_v41 = vadd.f32 %v2974_v36, %v603_v40 }
 0x279   : > { %v3069_v42 = vpop.f32.mrf.mxu0 }
 0x27a   : > { %621 = vrot.lane.b32.xlu1 %v3873_v38, %s3578_s10  ;;  %617 = vrot.lane.b32.xlu0 %v3877_v41, %s3576_s23  ;;  %s3452_s23 = sshll.u32 %s3586_s12, 4  ;;  %s3453_s23 = int_to_ptr.vmem [resolvable:$false] %s3452_s23 }
 0x27b   : > { %s3454_s30 = scalar_lea.vmem %s3453_s23, 2048  ;;  %p3455_p0 = scmp.lt.s32.totalorder %s4291_s11, %s3453_s23 }
 0x27c   : > { %p3456_p1 = scmp.lt.s32.totalorder %s3454_s30, %s3448_s3 }
 0x27e   : > { %899 = vrot.lane.b32.xlu0 %v3873_v38, %s3579_s17  ;;  %611 = vrot.lane.b32.xlu1 %v3877_v41, %s3577_s13  ;;  %p3457_p3 = por %p3456_p1, %p3455_p0 }
 0x280   : > { %p3458_p6 = pnand %p3457_p3, %p3451_p10 }
 0x282   : > { %623 = vrot.lane.b32.xlu1 %v3877_v41, %s3578_s10 }
 0x2e8   : > { %v3884_v43 = vpop.permute.xlu1 %615  ;;  %v3886_v44 = vpop.permute.xlu0 %609 }
 0x2e9   : > { %907 = vrot.lane.b32.xlu0 %v3884_v43, %s3579_s17  ;;  %903 = vrot.lane.b32.xlu1 %v3886_v44, %s3579_s17  ;;  %v627_v59 = vcombine.low %v3873_v38, %v3884_v43  ;;  %v628_v60 = vcombine.high %v3873_v38, %v3884_v43 }
 0x2eb   : > { %v635_v0 = vrot.slane %v627_v59, %v3907_v58  ;;  %v642_v1 = vrot.slane %v628_v60, %v3907_v58 }
 0x2ec   : > { %v3890_v45 = vpop.permute.xlu1 %621  ;;  %v3894_v46 = vpop.permute.xlu0 %617 }
 0x2ed   : > { %901 = vrot.lane.b32.xlu0 %v3877_v41, %s3579_s17  ;;  %911 = vrot.lane.b32.xlu1 %v3890_v45, %s3579_s17  ;;  %v643_v56 = vcombine.low %v3886_v44, %v3890_v45  ;;  %v644_v57 = vcombine.high %v3886_v44, %v3890_v45  ;;  %v695_v19 = vcombine.low %v3877_v41, %v3894_v46 }
 0x2ee   : > { %v696_v20 = vcombine.high %v3877_v41, %v3894_v46 }
 0x2ef   : > { %v651_v62 = vrot.slane %v643_v56, %v3907_v58  ;;  %v658_v63 = vrot.slane %v644_v57, %v3907_v58  ;;  %v703_v33 = vrot.slane %v695_v19, %v3907_v58 }
 0x2f0   : > { %v3896_v47 = vpop.permute.xlu1 %611  ;;  %v900_v7 = vpop.permute.xlu0 %899  ;;  %v3945_v34 = vrot.slane %v696_v20, %v3907_v58 }
 0x2f1   : > { %909 = vrot.lane.b32.xlu0 %v3894_v46, %s3579_s17  ;;  %905 = vrot.lane.b32.xlu1 %v3896_v47, %s3579_s17  ;;  %v659_v3 = vcombine.low %v635_v0, %v651_v62  ;;  %v660_v4 = vcombine.high %v635_v0, %v651_v62  ;;  %v675_v5 = vcombine.low %v642_v1, %v658_v63 }
 0x2f2   : > { %v676_v6 = vcombine.high %v642_v1, %v658_v63 }
 0x2f3   : > { %v667_v8 = vrot.slane %v659_v3, %v3917_v2  ;;  %v674_v9 = vrot.slane %v660_v4, %v3917_v2  ;;  %v683_v10 = vrot.slane %v675_v5, %v3917_v2 }
 0x2f4   : > { %v3900_v48 = vpop.permute.xlu1 %623  ;;  %v690_v11 = vrot.slane %v676_v6, %v3917_v2 }
 0x2f5   : > { %913 = vrot.lane.b32.xlu1 %v3900_v48, %s3579_s17  ;;  %v763_v14 = vcombine.low %v667_v8, %v674_v9  ;;  %v2978_v15 = vcombine.high %v667_v8, %v674_v9  ;;  %v711_v21 = vcombine.low %v3896_v47, %v3900_v48  ;;  %v712_v22 = vcombine.high %v3896_v47, %v3900_v48 }
 0x2f6   : > { %v779_v16 = vcombine.low %v683_v10, %v690_v11  ;;  %v2979_v18 = vcombine.high %v683_v10, %v690_v11 }
 0x2f7   : > { %v3932_v27 = vrot.slane %v763_v14, %v3907_v58  ;;  %v3935_v28 = vrot.slane %v2978_v15, %v3907_v58  ;;  %v719_v35 = vrot.slane %v711_v21, %v3907_v58  ;;  %v3949_v36 = vrot.slane %v712_v22, %v3907_v58 }
 0x2f8   : > { %v3938_v29 = vrot.slane %v779_v16, %v3907_v58  ;;  %v3941_v30 = vrot.slane %v2979_v18, %v3907_v58 }
 0x2f9   : > { %v795_v50 = vcombine.low %v3932_v27, %v3935_v28  ;;  %v796_v51 = vcombine.high %v3932_v27, %v3935_v28  ;;  %v727_v60 = vcombine.low %v703_v33, %v719_v35  ;;  %v728_v61 = vcombine.high %v703_v33, %v719_v35 }
 0x2fa   : > { %v811_v52 = vcombine.low %v3938_v29, %v3941_v30  ;;  %v812_v53 = vcombine.high %v3938_v29, %v3941_v30  ;;  %v743_v62 = vcombine.low %v3945_v34, %v3949_v36  ;;  %v744_v63 = vcombine.high %v3945_v34, %v3949_v36 }
 0x2fb   : > { %v803_v8 = vrot.slane %v795_v50, %v3917_v2  ;;  %v3974_v14 = vrot.slane %v727_v60, %v3917_v2  ;;  %v3977_v15 = vrot.slane %v728_v61, %v3917_v2 }
 0x2fc   : > { %v819_v9 = vrot.slane %v811_v52, %v3917_v2 }
 0x35b   : > { %v908_v12 = vpop.permute.xlu0 %907  ;;  %v904_v13 = vpop.permute.xlu1 %903 }
 0x35c   : > { %v923_v23 = vcombine.low %v900_v7, %v908_v12  ;;  %v924_v24 = vcombine.high %v900_v7, %v908_v12 }
 0x35e   : > { %v931_v37 = vrot.slane %v923_v23, %v3907_v58  ;;  %v938_v39 = vrot.slane %v924_v24, %v3907_v58 }
 0x35f   : > { %v902_v25 = vpop.permute.xlu0 %901  ;;  %v912_v26 = vpop.permute.xlu1 %911 }
 0x360   : > { %v939_v31 = vcombine.low %v904_v13, %v912_v26  ;;  %v940_v32 = vcombine.high %v904_v13, %v912_v26 }
 0x362   : > { %v947_v40 = vrot.slane %v939_v31, %v3907_v58  ;;  %v954_v42 = vrot.slane %v940_v32, %v3907_v58 }
 0x363   : > { %v906_v49 = vpop.permute.xlu1 %905  ;;  %v910_v59 = vpop.permute.xlu0 %909 }
 0x364   : > { %v955_v54 = vcombine.low %v931_v37, %v947_v40  ;;  %v956_v55 = vcombine.high %v931_v37, %v947_v40  ;;  %v971_v56 = vcombine.low %v938_v39, %v954_v42  ;;  %v972_v57 = vcombine.high %v938_v39, %v954_v42 }
 0x365   : > { %v991_v5 = vcombine.low %v902_v25, %v910_v59  ;;  %v992_v6 = vcombine.high %v902_v25, %v910_v59  ;;  %v758_v59 = vrot.slane %v744_v63, %v3917_v2 }
 0x366   : > { %v963_v0 = vrot.slane %v955_v54, %v3917_v2  ;;  %v970_v1 = vrot.slane %v956_v55, %v3917_v2  ;;  %v979_v3 = vrot.slane %v971_v56, %v3917_v2  ;;  %v986_v4 = vrot.slane %v972_v57, %v3917_v2 }
 0x367   : > { %v914_v7 = vpop.permute.xlu1 %913  ;;  %v999_v23 = vrot.slane %v991_v5, %v3907_v58  ;;  %v1006_v24 = vrot.slane %v992_v6, %v3907_v58  ;;  %v751_v57 = vrot.slane %v743_v62, %v3917_v2 }
 0x368   : > { %v1059_v10 = vcombine.low %v963_v0, %v970_v1  ;;  %v2982_v11 = vcombine.high %v963_v0, %v970_v1  ;;  %v1075_v12 = vcombine.low %v979_v3, %v986_v4  ;;  %v2983_v13 = vcombine.high %v979_v3, %v986_v4 }
 0x369   : > { %v1007_v16 = vcombine.low %v906_v49, %v914_v7  ;;  %v1008_v18 = vcombine.high %v906_v49, %v914_v7  ;;  %v827_v7 = vcombine.low %v803_v8, %v819_v9 }
 0x36a   : > { %v1066_v19 = vrot.slane %v1059_v10, %v3907_v58  ;;  %v1074_v20 = vrot.slane %v2982_v11, %v3907_v58  ;;  %v1082_v21 = vrot.slane %v1075_v12, %v3907_v58  ;;  %v1090_v22 = vrot.slane %v2983_v13, %v3907_v58 }
 0x36b   : > { %v1015_v25 = vrot.slane %v1007_v16, %v3907_v58  ;;  %v1022_v26 = vrot.slane %v1008_v18, %v3907_v58  ;;  %v828_v18 = vcombine.high %v803_v8, %v819_v9 }
 0x36c   : > { %v1091_v31 = vcombine.low %v1066_v19, %v1074_v20  ;;  %v1107_v32 = vcombine.low %v1082_v21, %v1090_v22  ;;  %v1092_v33 = vcombine.high %v1066_v19, %v1074_v20  ;;  %v1108_v34 = vcombine.high %v1082_v21, %v1090_v22 }
 0x36d   : > { %v1023_v35 = vcombine.low %v999_v23, %v1015_v25  ;;  %v1024_v36 = vcombine.high %v999_v23, %v1015_v25  ;;  %v1039_v37 = vcombine.low %v1006_v24, %v1022_v26  ;;  %v1040_v39 = vcombine.high %v1006_v24, %v1022_v26 }
 0x36e   : > { %v1099_v40 = vrot.slane %v1091_v31, %v3917_v2  ;;  %v1115_v42 = vrot.slane %v1107_v32, %v3917_v2  ;;  %v1106_v49 = vrot.slane %v1092_v33, %v3917_v2  ;;  %v1122_v50 = vrot.slane %v1108_v34, %v3917_v2 }
 0x36f   : > { %v1031_v52 = vrot.slane %v1023_v35, %v3917_v2  ;;  %v1038_v54 = vrot.slane %v1024_v36, %v3917_v2  ;;  %v1047_v55 = vrot.slane %v1039_v37, %v3917_v2  ;;  %v1054_v56 = vrot.slane %v1040_v39, %v3917_v2 }
 0x370   : > { %v1123_v60 = vcombine.low %v1099_v40, %v1115_v42  ;;  %v1124_v61 = vcombine.high %v1099_v40, %v1115_v42  ;;  %v1125_v10 = vcombine.low %v1106_v49, %v1122_v50  ;;  %v1126_v19 = vcombine.high %v1106_v49, %v1122_v50 }
 0x371   : > { %v1127_v0 = vcombine.low %v1031_v52, %v1038_v54  ;;  %v2984_v1 = vcombine.high %v1031_v52, %v1038_v54  ;;  %v1143_v3 = vcombine.low %v1047_v55, %v1054_v56  ;;  %v2985_v4 = vcombine.high %v1047_v55, %v1054_v56 }
 0x372   : > { %v1499_v5 = vpack.c.bf16 %v1123_v60, %v1123_v60  ;;  %v1500_v6 = vpack.c.bf16 %v1124_v61, %v1124_v61  ;;  %v831_v20 = vcombine.low %v3974_v14, %v3977_v15  ;;  %v2980_v23 = vcombine.high %v3974_v14, %v3977_v15 }
 0x373   : > { %v1134_v11 = vrot.slane %v1127_v0, %v3907_v58  ;;  %v1142_v12 = vrot.slane %v2984_v1, %v3907_v58  ;;  %v1150_v13 = vrot.slane %v1143_v3, %v3907_v58  ;;  %v1158_v62 = vrot.slane %v2985_v4, %v3907_v58 }
 0x374   : > { %v1512_v63 = vsel %vm1507_vm3, %v1499_v5, 0  ;;  %v1558_v16 = vsel %vm1507_vm3, %v1500_v6, 0  ;;  %v847_v24 = vcombine.low %v751_v57, %v758_v59  ;;  %v2981_v25 = vcombine.high %v751_v57, %v758_v59 }
 0x375   : > { %3071 = vmatpush3.bf16.xpose.msra.mxu1 %v1512_v63  ;;  %3077 = vmatpush3.bf16.xpose.msra.mxu0 %v1558_v16  ;;  %v1159_v21 = vcombine.low %v1134_v11, %v1142_v12  ;;  %v1175_v22 = vcombine.low %v1150_v13, %v1158_v62  ;;  %v1501_v26 = vpack.c.bf16 %v1125_v10, %v1125_v10 }
 0x376   : > { %3082 = vmatprep.subr.bf16.mxu1 %v3574_v17  ;;  %3088 = vmatprep.subr.bf16.mxu0 %v3574_v17  ;;  %v1502_v31 = vpack.c.bf16 %v1126_v19, %v1126_v19  ;;  %v1491_v32 = vpack.c.bf16 %v827_v7, %v827_v7  ;;  %v1492_v33 = vpack.c.bf16 %v828_v18, %v828_v18 }
 0x377   : > { %v1167_v8 = vrot.slane %v1159_v21, %v3917_v2  ;;  %v1183_v9 = vrot.slane %v1175_v22, %v3917_v2  ;;  %v810_v34 = vrot.slane %v796_v51, %v3917_v2  ;;  %v826_v14 = vrot.slane %v812_v53, %v3917_v2 }
 0x378   : > { %v838_v15 = vrot.slane %v831_v20, %v3907_v58  ;;  %v846_v35 = vrot.slane %v2980_v23, %v3907_v58  ;;  %v854_v36 = vrot.slane %v847_v24, %v3907_v58  ;;  %v862_v37 = vrot.slane %v2981_v25, %v3907_v58 }
 0x379   : > { %v1604_v39 = vsel %vm1507_vm3, %v1501_v26, 0  ;;  %v1160_v40 = vcombine.high %v1134_v11, %v1142_v12  ;;  %v1650_v27 = vsel %vm1507_vm3, %v1502_v31, 0  ;;  %v1191_v28 = vcombine.low %v1167_v8, %v1183_v9 }
 0x37a   : > { %v1192_v29 = vcombine.high %v1167_v8, %v1183_v9  ;;  %v1176_v30 = vcombine.high %v1150_v13, %v1158_v62  ;;  %v829_v51 = vcombine.low %v810_v34, %v826_v14  ;;  %v830_v53 = vcombine.high %v810_v34, %v826_v14 }
 0x37b   : > { %v863_v42 = vcombine.low %v838_v15, %v846_v35  ;;  %v879_v49 = vcombine.low %v854_v36, %v862_v37  ;;  %v1503_v50 = vpack.c.bf16 %v1191_v28, %v1191_v28  ;;  %v1174_v54 = vrot.slane %v1160_v40, %v3917_v2 }
 0x37c   : > { %3073 = vmatmul.mubr.msk.bf16.vlgmr.msra.gmra.mxu1 %vm1507_vm3, %v1491_v32  ;;  %3079 = vmatmul.mubr.msk.bf16.vlgmr.msra.gmra.mxu0 %vm1507_vm3, %v1492_v33  ;;  %v1504_v52 = vpack.c.bf16 %v1192_v29, %v1192_v29  ;;  %v1190_v55 = vrot.slane %v1176_v30, %v3917_v2  ;;  %v1493_v56 = vpack.c.bf16 %v829_v51, %v829_v51 }
 0x37d   : > { %3083 = vmatpush3.bf16.xpose.msra.mxu1 %v1604_v39  ;;  %3089 = vmatpush3.bf16.xpose.msra.mxu0 %v1650_v27  ;;  %v1494_v57 = vpack.c.bf16 %v830_v53, %v830_v53  ;;  %v871_v59 = vrot.slane %v863_v42, %v3917_v2  ;;  %v887_v60 = vrot.slane %v879_v49, %v3917_v2  ;;  %v1696_v61 = vsel %vm1507_vm3, %v1503_v50, 0 }
 0x37e   : > { %3084 = vmatprep.mubr.msk.bf16.mxu1 %vm3575_vm2, %v3574_v17  ;;  %3090 = vmatprep.mubr.msk.bf16.mxu0 %vm3575_vm2, %v3574_v17  ;;  %v1742_v0 = vsel %vm1507_vm3, %v1504_v52, 0  ;;  %v1193_v1 = vcombine.low %v1174_v54, %v1190_v55  ;;  %v1194_v3 = vcombine.high %v1174_v54, %v1190_v55  ;;  %v864_v4 = vcombine.high %v838_v15, %v846_v35 }
 0x37f   : > { %3094 = vmatprep.subr.bf16.mxu1 %v3574_v17  ;;  %3100 = vmatprep.subr.bf16.mxu0 %v3574_v17  ;;  %v895_v5 = vcombine.low %v871_v59, %v887_v60  ;;  %v896_v6 = vcombine.high %v871_v59, %v887_v60  ;;  %v880_v7 = vcombine.high %v854_v36, %v862_v37 }
 0x380   : > { %v1505_v10 = vpack.c.bf16 %v1193_v1, %v1193_v1  ;;  %v1506_v11 = vpack.c.bf16 %v1194_v3, %v1194_v3  ;;  %v878_v62 = vrot.slane %v864_v4, %v3917_v2 }
 0x381   : > { %v1495_v12 = vpack.c.bf16 %v895_v5, %v895_v5  ;;  %v1496_v13 = vpack.c.bf16 %v896_v6, %v896_v6  ;;  %v894_v63 = vrot.slane %v880_v7, %v3917_v2 }
 0x382   : > { %v1788_v16 = vsel %vm1507_vm3, %v1505_v10, 0  ;;  %v1834_v18 = vsel %vm1507_vm3, %v1506_v11, 0 }
 0x383   : > { %v897_v19 = vcombine.low %v878_v62, %v894_v63  ;;  %v898_v20 = vcombine.high %v878_v62, %v894_v63 }
 0x384   : > { %3085 = vmatmul.mubr.msk.bf16.vlgmr.msra.gmra.mxu1 %vm1507_vm3, %v1493_v56  ;;  %3091 = vmatmul.mubr.msk.bf16.vlgmr.msra.gmra.mxu0 %vm1507_vm3, %v1494_v57 }
 0x385   : > { %3095 = vmatpush3.bf16.xpose.msra.mxu1 %v1696_v61  ;;  %3101 = vmatpush3.bf16.xpose.msra.mxu0 %v1742_v0  ;;  %v1497_v21 = vpack.c.bf16 %v897_v19, %v897_v19  ;;  %v1498_v22 = vpack.c.bf16 %v898_v20, %v898_v20 }
 0x386   : > { %3096 = vmatprep.mubr.msk.bf16.mxu1 %vm3575_vm2, %v3574_v17  ;;  %3102 = vmatprep.mubr.msk.bf16.mxu0 %vm3575_vm2, %v3574_v17 }
 0x387   : > { %3106 = vmatprep.subr.bf16.mxu1 %v3574_v17  ;;  %3112 = vmatprep.subr.bf16.mxu0 %v3574_v17 }
 0x38c   : > { %3097 = vmatmul.mubr.msk.bf16.vlgmr.msra.gmra.mxu1 %vm1507_vm3, %v1495_v12  ;;  %3103 = vmatmul.mubr.msk.bf16.vlgmr.msra.gmra.mxu0 %vm1507_vm3, %v1496_v13 }
 0x38d   : > { %3107 = vmatpush3.bf16.xpose.msra.mxu1 %v1788_v16  ;;  %3113 = vmatpush3.bf16.xpose.msra.mxu0 %v1834_v18 }
 0x38e   : > { %3108 = vmatprep.mubr.msk.bf16.mxu1 %vm3575_vm2, %v3574_v17  ;;  %3114 = vmatprep.mubr.msk.bf16.mxu0 %vm3575_vm2, %v3574_v17 }
 0x38f   : > { %3118 = vmatprep.subr.bf16.mxu1 %v3574_v17  ;;  %3124 = vmatprep.subr.bf16.mxu0 %v3574_v17 }
 0x394   : > { %3109 = vmatmul.mubr.msk.bf16.vlgmr.msra.gmra.mxu1 %vm1507_vm3, %v1497_v21  ;;  %3115 = vmatmul.mubr.msk.bf16.vlgmr.msra.gmra.mxu0 %vm1507_vm3, %v1498_v22 }
 0x395   : > { %3120 = vmatprep.mubr.msk.bf16.mxu1 %vm3575_vm2, %v3574_v17  ;;  %3126 = vmatprep.mubr.msk.bf16.mxu0 %vm3575_vm2, %v3574_v17 }
 0x43c   : > { %v1548_v23 = vpop.f32.mrf.mxu1  ;;  %v1594_v24 = vpop.f32.mrf.mxu0 }
 0x43d   : > { %v4065_v25 = vmul.f32 0.35355338, %v1548_v23  ;;  %v4067_v26 = vmul.f32 0.35355338, %v1594_v24 }
 0x43e   : > { %v3074_v31 = vpop.f32.mrf.mxu1  ;;  %v3080_v8 = vpop.f32.mrf.mxu0 }
 0x43f   : > { %v1884_v9 = vsel %vm1507_vm3, %v4065_v25, -inf  ;;  %v1887_v32 = vsel %vm1507_vm3, %v4067_v26, -inf }
 0x440   : > { %1885 = vmax.xlane.f32.xlu0 %v1884_v9  ;;  %v1551_v33 = vpop.f32.mrf.mxu1  ;;  %1888 = vmax.xlane.f32.xlu1 %v1887_v32  ;;  %v1597_v34 = vpop.f32.mrf.mxu0 }
 0x442   : > { %v3075_v14 = vpop.f32.mrf.mxu1  ;;  %v3081_v15 = vpop.f32.mrf.mxu0 }
 0x444   : > { %v1640_v35 = vpop.f32.mrf.mxu1  ;;  %v1686_v36 = vpop.f32.mrf.mxu0 }
 0x445   : > { %v1878_v37 = vmul.f32 0.35355338, %v1640_v35  ;;  %v1879_v27 = vmul.f32 0.35355338, %v1686_v36 }
 0x446   : > { %v3086_v39 = vpop.f32.mrf.mxu1  ;;  %v3092_v40 = vpop.f32.mrf.mxu0 }
 0x447   : > { %v1890_v28 = vsel %vm1507_vm3, %v1878_v37, -inf  ;;  %v1893_v42 = vsel %vm1507_vm3, %v1879_v27, -inf }
 0x448   : > { %1891 = vmax.xlane.f32.xlu0 %v1890_v28  ;;  %v1643_v29 = vpop.f32.mrf.mxu1  ;;  %v1689_v30 = vpop.f32.mrf.mxu0 }
 0x44a   : > { %v3087_v51 = vpop.f32.mrf.mxu1  ;;  %v3093_v53 = vpop.f32.mrf.mxu0 }
 0x44c   : > { %v1732_v49 = vpop.f32.mrf.mxu1  ;;  %1894 = vmax.xlane.f32.xlu0 %v1893_v42  ;;  %v1778_v50 = vpop.f32.mrf.mxu0 }
 0x44d   : > { %v1880_v52 = vmul.f32 0.35355338, %v1732_v49  ;;  %v1881_v54 = vmul.f32 0.35355338, %v1778_v50 }
 0x44e   : > { %v3098_v55 = vpop.f32.mrf.mxu1  ;;  %v3104_v56 = vpop.f32.mrf.mxu0 }
 0x44f   : > { %v1896_v57 = vsel %vm1507_vm3, %v1880_v52, -inf  ;;  %v1899_v59 = vsel %vm1507_vm3, %v1881_v54, -inf }
 0x450   : > { %v1735_v60 = vpop.f32.mrf.mxu1  ;;  %1897 = vmax.xlane.f32.xlu0 %v1896_v57  ;;  %1900 = vmax.xlane.f32.xlu1 %v1899_v59  ;;  %v1781_v61 = vpop.f32.mrf.mxu0 }
 0x452   : > { %v3099_v0 = vpop.f32.mrf.mxu1  ;;  %v3105_v1 = vpop.f32.mrf.mxu0 }
 0x454   : > { %v1824_v3 = vpop.f32.mrf.mxu1  ;;  %v1870_v4 = vpop.f32.mrf.mxu0 }
 0x455   : > { %v4077_v5 = vmul.f32 0.35355338, %v1824_v3  ;;  %v1883_v63 = vmul.f32 0.35355338, %v1870_v4 }
 0x456   : > { %v3110_v6 = vpop.f32.mrf.mxu1  ;;  %v3116_v7 = vpop.f32.mrf.mxu0 }
 0x457   : > { %v1902_v10 = vsel %vm1507_vm3, %v4077_v5, -inf  ;;  %v1905_v16 = vsel %vm1507_vm3, %v1883_v63, -inf }
 0x458   : > { %v1827_v11 = vpop.f32.mrf.mxu1  ;;  %1903 = vmax.xlane.f32.xlu0 %v1902_v10  ;;  %v1873_v12 = vpop.f32.mrf.mxu0 }
 0x45a   : > { %v3111_v13 = vpop.f32.mrf.mxu1  ;;  %v3117_v62 = vpop.f32.mrf.mxu0 }
 0x461   : > { %1199 = vrot.lane.b32.xlu1 %v3886_v44, %s3582_s25 }
 0x465   : > { %1203 = vrot.lane.b32.xlu1 %v3884_v43, %s3582_s25 }
 0x46e   : > { %1195 = vrot.lane.b32.xlu0 %v3873_v38, %s3582_s25 }
 0x489   : > { %1906 = vmax.xlane.f32.xlu1 %v1905_v16 }
 0x49a   : > { %1207 = vrot.lane.b32.xlu1 %v3890_v45, %s3582_s25 }
 0x4c9   : > { %v1886_v18 = vpop.xlane.xlu0 %1885  ;;  %v1889_v19 = vpop.xlane.xlu1 %1888 }
 0x4ca   : > { %v1908_v20 = vsub.f32 %v4065_v25, %v1886_v18  ;;  %v1909_v21 = vsub.f32 %v4067_v26, %v1889_v19 }
 0x4cc   : > { %v1916_v44 = vmul.f32 1.442695, %v1908_v20  ;;  %v1918_v22 = vmul.f32 1.442695, %v1909_v21 }
 0x4ce   : > { %3304 = vpow2.f32 %v1916_v44 }
 0x4cf   : > { %3306 = vpow2.f32 %v1918_v22 }
 0x4d1   : > { %v1892_v43 = vpop.xlane.xlu0 %1891 }
 0x4d2   : > { %v1910_v23 = vsub.f32 %v1878_v37, %v1892_v43 }
 0x4d4   : > { %v1920_v38 = vmul.f32 1.442695, %v1910_v23 }
 0x4d5   : > { %v1895_v24 = vpop.xlane.xlu0 %1894 }
 0x4d6   : > { %3308 = vpow2.f32 %v1920_v38  ;;  %v1911_v31 = vsub.f32 %v1879_v27, %v1895_v24 }
 0x4d8   : > { %v1922_v8 = vmul.f32 1.442695, %v1911_v31 }
 0x4d9   : > { %v1898_v9 = vpop.xlane.xlu0 %1897  ;;  %v1901_v32 = vpop.xlane.xlu1 %1900 }
 0x4da   : > { %3310 = vpow2.f32 %v1922_v8  ;;  %v1912_v45 = vsub.f32 %v1880_v52, %v1898_v9  ;;  %v1913_v33 = vsub.f32 %v1881_v54, %v1901_v32 }
 0x4db   : > { %v4092_v34 = vpop.eup %3304 }
 0x4dc   : > { %v4094_v25 = vpop.eup %3306  ;;  %v1924_v26 = vmul.f32 1.442695, %v1912_v45  ;;  %v1926_v14 = vmul.f32 1.442695, %v1913_v33  ;;  %v1932_v15 = vsel %vm1507_vm3, %v4092_v34, 0.0 }
 0x4dd   : > { %1933 = vadd.xlane.f32.xlu0 %v1932_v15  ;;  %v1935_v35 = vsel %vm1507_vm3, %v4094_v25, 0.0  ;;  %v1200_v51 = vpop.permute.xlu1 %1199 }
 0x4de   : > { %3312 = vpow2.f32 %v1924_v26  ;;  %1936 = vadd.xlane.f32.xlu1 %v1935_v35 }
 0x4df   : > { %3314 = vpow2.f32 %v1926_v14 }
 0x4e1   : > { %v1904_v53 = vpop.xlane.xlu0 %1903  ;;  %v1204_v49 = vpop.permute.xlu1 %1203 }
 0x4e2   : > { %v1914_v42 = vsub.f32 %v4077_v5, %v1904_v53 }
 0x4e3   : > { %v4100_v36 = vpop.eup %3308 }
 0x4e4   : > { %v1938_v37 = vsel %vm1507_vm3, %v4100_v36, 0.0  ;;  %v1928_v50 = vmul.f32 1.442695, %v1914_v42 }
 0x4e5   : > { %1939 = vadd.xlane.f32.xlu0 %v1938_v37  ;;  %v1196_v52 = vpop.permute.xlu0 %1195 }
 0x4e6   : > { %3316 = vpow2.f32 %v1928_v50  ;;  %v1220_v56 = vcombine.high %v1196_v52, %v1204_v49 }
 0x4e7   : > { %v4104_v39 = vpop.eup %3310 }
 0x4e8   : > { %v1941_v40 = vsel %vm1507_vm3, %v4104_v39, 0.0 }
 0x4e9   : > { %1942 = vadd.xlane.f32.xlu1 %v1941_v40 }
 0x4eb   : > { %v4108_v27 = vpop.eup %3312 }
 0x4ec   : > { %v1944_v28 = vsel %vm1507_vm3, %v4108_v27, 0.0  ;;  %v4112_v29 = vpop.eup %3314 }
 0x4ed   : > { %1945 = vadd.xlane.f32.xlu0 %v1944_v28  ;;  %v1947_v30 = vsel %vm1507_vm3, %v4112_v29, 0.0 }
 0x4f1   : > { %1948 = vadd.xlane.f32.xlu0 %v1947_v30 }
 0x4f3   : > { %v4133_v16 = vpop.eup %3316 }
 0x4f4   : > { %v1950_v24 = vsel %vm1507_vm3, %v4133_v16, 0.0 }
 0x4fa   : > { %1201 = vrot.lane.b32.xlu1 %v3896_v47, %s3582_s25  ;;  %v1219_v47 = vcombine.low %v1196_v52, %v1204_v49 }
 0x4fc   : > { %v1227_v60 = vrot.slane %v1219_v47, %v3907_v58 }
 0x4fe   : > { %1205 = vrot.lane.b32.xlu1 %v3894_v46, %s3582_s25 }
 0x502   : > { %1209 = vrot.lane.b32.xlu1 %v3900_v48, %s3582_s25 }
 0x507   : > { %1197 = vrot.lane.b32.xlu0 %v3877_v41, %s3582_s25  ;;  %v1234_v41 = vrot.slane %v1220_v56, %v3907_v58 }
 0x512   : > { %v1907_v54 = vpop.xlane.xlu1 %1906 }
 0x513   : > { %v1915_v55 = vsub.f32 %v1883_v63, %v1907_v54 }
 0x515   : > { %v1930_v57 = vmul.f32 1.442695, %v1915_v55 }
 0x516   : > { %v1208_v46 = vpop.permute.xlu1 %1207 }
 0x517   : > { %3318 = vpow2.f32 %v1930_v57  ;;  %v1235_v59 = vcombine.low %v1200_v51, %v1208_v46  ;;  %v1236_v48 = vcombine.high %v1200_v51, %v1208_v46 }
 0x519   : > { %v1243_v61 = vrot.slane %v1235_v59, %v3907_v58  ;;  %v1250_v0 = vrot.slane %v1236_v48, %v3907_v58 }
 0x51b   : > { %v1251_v1 = vcombine.low %v1227_v60, %v1243_v61  ;;  %v1252_v3 = vcombine.high %v1227_v60, %v1243_v61  ;;  %v1267_v4 = vcombine.low %v1234_v41, %v1250_v0  ;;  %v1268_v5 = vcombine.high %v1234_v41, %v1250_v0 }
 0x51d   : > { %v1259_v6 = vrot.slane %v1251_v1, %v3917_v2  ;;  %v1266_v7 = vrot.slane %v1252_v3, %v3917_v2  ;;  %v1275_v10 = vrot.slane %v1267_v4, %v3917_v2  ;;  %v1282_v11 = vrot.slane %v1268_v5, %v3917_v2 }
 0x51f   : > { %v1355_v12 = vcombine.low %v1259_v6, %v1266_v7  ;;  %v2986_v13 = vcombine.high %v1259_v6, %v1266_v7  ;;  %v1371_v62 = vcombine.low %v1275_v10, %v1282_v11  ;;  %v2987_v63 = vcombine.high %v1275_v10, %v1282_v11 }
 0x521   : > { %v1362_v18 = vrot.slane %v1355_v12, %v3907_v58  ;;  %v1370_v19 = vrot.slane %v2986_v13, %v3907_v58  ;;  %v1378_v20 = vrot.slane %v1371_v62, %v3907_v58  ;;  %v1386_v21 = vrot.slane %v2987_v63, %v3907_v58 }
 0x523   : > { %v1387_v44 = vcombine.low %v1362_v18, %v1370_v19  ;;  %v1403_v22 = vcombine.low %v1378_v20, %v1386_v21  ;;  %v1388_v43 = vcombine.high %v1362_v18, %v1370_v19  ;;  %v1404_v23 = vcombine.high %v1378_v20, %v1386_v21 }
 0x524   : > { %v4139_v38 = vpop.eup %3318 }
 0x525   : > { %v1953_v31 = vsel %vm1507_vm3, %v4139_v38, 0.0  ;;  %v1395_v8 = vrot.slane %v1387_v44, %v3917_v2  ;;  %v1411_v9 = vrot.slane %v1403_v22, %v3917_v2  ;;  %v1402_v32 = vrot.slane %v1388_v43, %v3917_v2 }
 0x526   : > { %1951 = vadd.xlane.f32.xlu0 %v1950_v24  ;;  %1954 = vadd.xlane.f32.xlu1 %v1953_v31  ;;  %v1418_v45 = vrot.slane %v1404_v23, %v3917_v2 }
 0x527   : > { %v1419_v33 = vcombine.low %v1395_v8, %v1411_v9  ;;  %v1420_v26 = vcombine.high %v1395_v8, %v1411_v9 }
 0x528   : > { %v1421_v14 = vcombine.low %v1402_v32, %v1418_v45  ;;  %v1422_v15 = vcombine.high %v1402_v32, %v1418_v45 }
 0x529   : > { %v1988_v35 = vpack.c.bf16 %v1419_v33, %v1419_v33  ;;  %v1989_v37 = vpack.c.bf16 %v1420_v26, %v1420_v26 }
 0x52a   : > { %v1990_v54 = vpack.c.bf16 %v1421_v14, %v1421_v14  ;;  %v1991_v57 = vpack.c.bf16 %v1422_v15, %v1422_v15 }
 0x52b   : > { %v2001_v40 = vsel %vm1999_vm4, %v1988_v35, 0  ;;  %v2047_v28 = vsel %vm1999_vm4, %v1989_v37, 0 }
 0x52c   : > { %3119 = vmatpush3.bf16.msra.mxu1 %v2001_v40  ;;  %3125 = vmatpush3.bf16.msra.mxu0 %v2047_v28  ;;  %v2093_v48 = vsel %vm1999_vm4, %v1990_v54, 0 }
 0x52d   : > { %3130 = vmatprep.subr.bf16.mxu1 %v3574_v17  ;;  %3136 = vmatprep.subr.bf16.mxu0 %v3574_v17 }
 0x566   : > { %v1934_v30 = vpop.xlane.xlu0 %1933 }
 0x567   : > { %3320 = vrcp.f32 %v1934_v30  ;;  %v1937_v51 = vpop.xlane.xlu1 %1936 }
 0x568   : > { %3322 = vrcp.f32 %v1937_v51 }
 0x56e   : > { %v1940_v53 = vpop.xlane.xlu0 %1939 }
 0x56f   : > { %3324 = vrcp.f32 %v1940_v53 }
 0x572   : > { %v1943_v42 = vpop.xlane.xlu1 %1942 }
 0x573   : > { %3326 = vrcp.f32 %v1943_v42 }
 0x574   : > { %v3321_v49 = vpop.eup %3320 }
 0x575   : > { %v3323_v50 = vpop.eup %3322  ;;  %v1964_v52 = vmul.f32 %v3321_v49, %v4092_v34  ;;  %v2139_v34 = vsel %vm1999_vm4, %v1991_v57, 0 }
 0x576   : > { %v1946_v55 = vpop.xlane.xlu0 %1945  ;;  %v1202_v47 = vpop.permute.xlu1 %1201  ;;  %v1965_v56 = vmul.f32 %v3323_v50, %v4094_v25 }
 0x577   : > { %3328 = vrcp.f32 %v1946_v55  ;;  %1972 = vst.msk [vmem:[%s3841_s24] sm:$0xff] %vm1507_vm3, %v1964_v52  ;;  %v1980_v46 = vpack.c.bf16 %v1964_v52, %v1964_v52 }
 0x578   : > { %1973 = vst.msk [vmem:[%s3841_s24 + $0x8] sm:$0xff] %vm1507_vm3, %v1965_v56  ;;  %v1981_v59 = vpack.c.bf16 %v1965_v56, %v1965_v56 }
 0x579   : > { %3121 = vmatmul.mubr.msk.bf16.vlgmr.msra.gmra.mxu1 %vm1507_vm3, %v1980_v46 }
 0x57a   : > { %3127 = vmatmul.mubr.msk.bf16.vlgmr.msra.gmra.mxu0 %vm1507_vm3, %v1981_v59  ;;  %3131 = vmatpush3.bf16.msra.mxu1 %v2093_v48  ;;  %v1949_v60 = vpop.xlane.xlu0 %1948  ;;  %v1206_v25 = vpop.permute.xlu1 %1205 }
 0x57b   : > { %3137 = vmatpush3.bf16.msra.mxu0 %v2139_v34  ;;  %3330 = vrcp.f32 %v1949_v60  ;;  %3132 = vmatprep.mubr.msk.bf16.mxu1 %vm3575_vm2, %v3574_v17 }
 0x57c   : > { %v3325_v41 = vpop.eup %3324  ;;  %3138 = vmatprep.mubr.msk.bf16.mxu0 %vm3575_vm2, %v3574_v17  ;;  %3142 = vmatprep.subr.bf16.mxu1 %v3574_v17 }
 0x57d   : > { %v1966_v61 = vmul.f32 %v3325_v41, %v4100_v36  ;;  %3148 = vmatprep.subr.bf16.mxu0 %v3574_v17 }
 0x57e   : > { %v1198_v0 = vpop.permute.xlu0 %1197  ;;  %v1210_v1 = vpop.permute.xlu1 %1209 }
 0x57f   : > { %v1287_v3 = vcombine.low %v1198_v0, %v1206_v25  ;;  %v1288_v4 = vcombine.high %v1198_v0, %v1206_v25  ;;  %v1303_v5 = vcombine.low %v1202_v47, %v1210_v1  ;;  %v1304_v6 = vcombine.high %v1202_v47, %v1210_v1  ;;  %1974 = vst.msk [vmem:[%s3841_s24 + $0x10] sm:$0xff] %vm1507_vm3, %v1966_v61 }
 0x580   : > { %v3327_v7 = vpop.eup %3326  ;;  %v1982_v10 = vpack.c.bf16 %v1966_v61, %v1966_v61 }
 0x581   : > { %v1295_v11 = vrot.slane %v1287_v3, %v3907_v58  ;;  %v1302_v12 = vrot.slane %v1288_v4, %v3907_v58  ;;  %v1311_v13 = vrot.slane %v1303_v5, %v3907_v58  ;;  %v1318_v36 = vrot.slane %v1304_v6, %v3907_v58 }
 0x582   : > { %3133 = vmatmul.mubr.msk.bf16.vlgmr.msra.gmra.mxu1 %vm1507_vm3, %v1982_v10  ;;  %v1967_v62 = vmul.f32 %v3327_v7, %v4104_v39 }
 0x583   : > { %v1319_v63 = vcombine.low %v1295_v11, %v1311_v13  ;;  %v1320_v18 = vcombine.high %v1295_v11, %v1311_v13  ;;  %v1335_v19 = vcombine.low %v1302_v12, %v1318_v36  ;;  %v1336_v20 = vcombine.high %v1302_v12, %v1318_v36  ;;  %3144 = vmatprep.mubr.msk.bf16.mxu1 %vm3575_vm2, %v3574_v17 }
 0x584   : > { %v3329_v21 = vpop.eup %3328  ;;  %1975 = vst.msk [vmem:[%s3841_s24 + $0x18] sm:$0xff] %vm1507_vm3, %v1967_v62  ;;  %v1983_v44 = vpack.c.bf16 %v1967_v62, %v1967_v62 }
 0x585   : > { %v1327_v22 = vrot.slane %v1319_v63, %v3917_v2  ;;  %v1334_v43 = vrot.slane %v1320_v18, %v3917_v2  ;;  %v1343_v23 = vrot.slane %v1335_v19, %v3917_v2  ;;  %v1350_v39 = vrot.slane %v1336_v20, %v3917_v2 }
 0x586   : > { %3139 = vmatmul.mubr.msk.bf16.vlgmr.msra.gmra.mxu0 %vm1507_vm3, %v1983_v44  ;;  %v1968_v24 = vmul.f32 %v3329_v21, %v4108_v27 }
 0x587   : > { %v1423_v31 = vcombine.low %v1327_v22, %v1334_v43  ;;  %v2988_v8 = vcombine.high %v1327_v22, %v1334_v43  ;;  %v1439_v9 = vcombine.low %v1343_v23, %v1350_v39  ;;  %v2989_v32 = vcombine.high %v1343_v23, %v1350_v39  ;;  %3150 = vmatprep.mubr.msk.bf16.mxu0 %vm3575_vm2, %v3574_v17 }
 0x588   : > { %v3331_v45 = vpop.eup %3330  ;;  %1976 = vst.msk [vmem:[%s3841_s24 + $0x20] sm:$0xff] %vm1507_vm3, %v1968_v24  ;;  %v1984_v59 = vpack.c.bf16 %v1968_v24, %v1968_v24 }
 0x589   : > { %v1430_v33 = vrot.slane %v1423_v31, %v3907_v58  ;;  %v1438_v26 = vrot.slane %v2988_v8, %v3907_v58  ;;  %v1446_v14 = vrot.slane %v1439_v9, %v3907_v58  ;;  %v1454_v15 = vrot.slane %v2989_v32, %v3907_v58 }
 0x58a   : > { %v1969_v27 = vmul.f32 %v3331_v45, %v4112_v29 }
 0x58b   : > { %v1455_v35 = vcombine.low %v1430_v33, %v1438_v26  ;;  %v1471_v37 = vcombine.low %v1446_v14, %v1454_v15  ;;  %v1456_v40 = vcombine.high %v1430_v33, %v1438_v26  ;;  %v1472_v28 = vcombine.high %v1446_v14, %v1454_v15 }
 0x58c   : > { %1977 = vst.msk [vmem:[%s3841_s24 + $0x28] sm:$0xff] %vm1507_vm3, %v1969_v27  ;;  %v1985_v48 = vpack.c.bf16 %v1969_v27, %v1969_v27 }
 0x58d   : > { %v1463_v30 = vrot.slane %v1455_v35, %v3917_v2  ;;  %v1479_v51 = vrot.slane %v1471_v37, %v3917_v2  ;;  %v1470_v53 = vrot.slane %v1456_v40, %v3917_v2  ;;  %v1486_v42 = vrot.slane %v1472_v28, %v3917_v2 }
 0x58f   : > { %v1487_v49 = vcombine.low %v1463_v30, %v1479_v51  ;;  %v1488_v50 = vcombine.high %v1463_v30, %v1479_v51  ;;  %v1489_v52 = vcombine.low %v1470_v53, %v1486_v42  ;;  %v1490_v54 = vcombine.high %v1470_v53, %v1486_v42 }
 0x591   : > { %v1992_v55 = vpack.c.bf16 %v1487_v49, %v1487_v49  ;;  %v1993_v29 = vpack.c.bf16 %v1488_v50, %v1488_v50  ;;  %v1994_v57 = vpack.c.bf16 %v1489_v52, %v1489_v52  ;;  %v1995_v46 = vpack.c.bf16 %v1490_v54, %v1490_v54 }
 0x593   : > { %v2185_v47 = vsel %vm1999_vm4, %v1992_v55, 0  ;;  %v2231_v56 = vsel %vm1999_vm4, %v1993_v29, 0  ;;  %v2277_v34 = vsel %vm1999_vm4, %v1994_v57, 0  ;;  %v2323_v60 = vsel %vm1999_vm4, %v1995_v46, 0 }
 0x594   : > { %3143 = vmatpush3.bf16.msra.mxu1 %v2185_v47  ;;  %3149 = vmatpush3.bf16.msra.mxu0 %v2231_v56 }
 0x595   : > { %3154 = vmatprep.subr.bf16.mxu1 %v3574_v17  ;;  %3160 = vmatprep.subr.bf16.mxu0 %v3574_v17 }
 0x597   : > { %3145 = vmatmul.mubr.msk.bf16.vlgmr.msra.gmra.mxu1 %vm1507_vm3, %v1984_v59  ;;  %3151 = vmatmul.mubr.msk.bf16.vlgmr.msra.gmra.mxu0 %vm1507_vm3, %v1985_v48 }
 0x598   : > { %3155 = vmatpush3.bf16.msra.mxu1 %v2277_v34  ;;  %3161 = vmatpush3.bf16.msra.mxu0 %v2323_v60 }
 0x599   : > { %3156 = vmatprep.mubr.msk.bf16.mxu1 %vm3575_vm2, %v3574_v17  ;;  %3162 = vmatprep.mubr.msk.bf16.mxu0 %vm3575_vm2, %v3574_v17 }
 0x59a   : > { %3166 = vmatprep.subr.bf16.mxu1 %v3574_v17 }
 0x5af   : > { %v1952_v25 = vpop.xlane.xlu0 %1951  ;;  %v1955_v41 = vpop.xlane.xlu1 %1954 }
 0x5b0   : > { %3332 = vrcp.f32 %v1952_v25 }
 0x5b1   : > { %3334 = vrcp.f32 %v1955_v41 }
 0x5bd   : > { %v3333_v61 = vpop.eup %3332 }
 0x5be   : > { %v3335_v0 = vpop.eup %3334  ;;  %v1970_v1 = vmul.f32 %v3333_v61, %v4133_v16 }
 0x5bf   : > { %v1971_v3 = vmul.f32 %v3335_v0, %v4139_v38 }
 0x5c0   : > { %1978 = vst.msk [vmem:[%s3841_s24 + $0x30] sm:$0xff] %vm1507_vm3, %v1970_v1  ;;  %v1986_v4 = vpack.c.bf16 %v1970_v1, %v1970_v1 }
 0x5c1   : > { %1979 = vst.msk [vmem:[%s3841_s24 + $0x38] sm:$0xff] %vm1507_vm3, %v1971_v3  ;;  %v1987_v5 = vpack.c.bf16 %v1971_v3, %v1971_v3 }
 0x5c2   : > { %3157 = vmatmul.mubr.msk.bf16.vlgmr.msra.gmra.mxu1 %vm1507_vm3, %v1986_v4 }
 0x5c3   : > { %3163 = vmatmul.mubr.msk.bf16.vlgmr.msra.gmra.mxu0 %vm1507_vm3, %v1987_v5  ;;  %3170 = vmatprep.mubr.msk.bf16.mxu1 %vm3575_vm2, %v3574_v17 }
 0x639   : > { %v2037_v6 = vpop.f32.mrf.mxu1 }
 0x63a   : > { %v2083_v7 = vpop.f32.mrf.mxu0 }
 0x63b   : > { %v3122_v10 = vpop.f32.mrf.mxu1 }
 0x63c   : > { %v3128_v11 = vpop.f32.mrf.mxu0 }
 0x63d   : > { %v2040_v16 = vpop.f32.mrf.mxu1 }
 0x63e   : > { %v2086_v12 = vpop.f32.mrf.mxu0 }
 0x63f   : > { %v3123_v38 = vpop.f32.mrf.mxu1 }
 0x640   : > { %v3129_v13 = vpop.f32.mrf.mxu0 }
 0x642   : > { %v2129_v36 = vpop.f32.mrf.mxu1 }
 0x643   : > { %v2365_v62 = vcombine.low %v2037_v6, %v2129_v36  ;;  %v2366_v63 = vcombine.high %v2037_v6, %v2129_v36 }
 0x644   : > { %v3134_v18 = vpop.f32.mrf.mxu1 }
 0x645   : > { %v2373_v23 = vrot.slane %v2365_v62, %v3907_v58  ;;  %v2380_v39 = vrot.slane %v2366_v63, %v3907_v58 }
 0x646   : > { %v2132_v19 = vpop.f32.mrf.mxu1  ;;  %v2175_v20 = vpop.f32.mrf.mxu0 }
 0x647   : > { %v2381_v21 = vcombine.low %v2083_v7, %v2175_v20  ;;  %v2382_v44 = vcombine.high %v2083_v7, %v2175_v20 }
 0x648   : > { %v3135_v22 = vpop.f32.mrf.mxu1  ;;  %v3140_v43 = vpop.f32.mrf.mxu0 }
 0x649   : > { %v2389_v24 = vrot.slane %v2381_v21, %v3907_v58  ;;  %v2396_v31 = vrot.slane %v2382_v44, %v3907_v58 }
 0x64a   : > { %v2178_v8 = vpop.f32.mrf.mxu0 }
 0x64b   : > { %v2397_v9 = vcombine.low %v2373_v23, %v2389_v24  ;;  %v2398_v32 = vcombine.high %v2373_v23, %v2389_v24  ;;  %v2413_v45 = vcombine.low %v2380_v39, %v2396_v31  ;;  %v2414_v33 = vcombine.high %v2380_v39, %v2396_v31 }
 0x64c   : > { %v3141_v26 = vpop.f32.mrf.mxu0 }
 0x64d   : > { %v2405_v14 = vrot.slane %v2397_v9, %v3917_v2  ;;  %v2412_v15 = vrot.slane %v2398_v32, %v3917_v2  ;;  %v2421_v27 = vrot.slane %v2413_v45, %v3917_v2  ;;  %v2428_v35 = vrot.slane %v2414_v33, %v3917_v2  ;;  %v3298_v26 = vld [vmem:[%s3818_s26 + $0x8] sm:$0xff]  }
 0x64e   : > { %3167 = vmatpush3.bf16.msra.mxu1 %v3298_v26 }
 0x64f   : > { %v2501_v37 = vcombine.low %v2405_v14, %v2412_v15  ;;  %v3006_v40 = vcombine.high %v2405_v14, %v2412_v15  ;;  %v2517_v28 = vcombine.low %v2421_v27, %v2428_v35  ;;  %v3007_v30 = vcombine.high %v2421_v27, %v2428_v35  ;;  %3168 = vmatprep.subr.bf16.mxu1 %v3574_v17 }
 0x651   : > { %v2508_v51 = vrot.slane %v2501_v37, %v3907_v58  ;;  %v2516_v53 = vrot.slane %v3006_v40, %v3907_v58  ;;  %v2524_v42 = vrot.slane %v2517_v28, %v3907_v58  ;;  %v2532_v49 = vrot.slane %v3007_v30, %v3907_v58 }
 0x653   : > { %v2534_v50 = vcombine.high %v2508_v51, %v2516_v53  ;;  %v2550_v52 = vcombine.high %v2524_v42, %v2532_v49  ;;  %v2533_v54 = vcombine.low %v2508_v51, %v2516_v53  ;;  %v2549_v55 = vcombine.low %v2524_v42, %v2532_v49  ;;  %v3299_v51 = vld [vmem:[%s3818_s26] sm:$0xff]   ;;  %s3585_s26 = smov 24  }
 0x654   : > { %3169 = vmatpush3.bf16.msra.mxu1 %v3299_v51 }
 0x655   : > { %v4239_v29 = vrot.slane %v2534_v50, %v3917_v2  ;;  %v4242_v47 = vrot.slane %v2550_v52, %v3917_v2  ;;  %v4245_v56 = vrot.slane %v2533_v54, %v3917_v2  ;;  %v4248_v57 = vrot.slane %v2549_v55, %v3917_v2 }
 0x657   : > { %v2221_v46 = vpop.f32.mrf.mxu1  ;;  %v2267_v59 = vpop.f32.mrf.mxu0  ;;  %v2567_v48 = vcombine.low %v4239_v29, %v4242_v47  ;;  %v2565_v34 = vcombine.low %v4245_v56, %v4248_v57  ;;  %v2566_v60 = vcombine.high %v4245_v56, %v4248_v57  ;;  %v2568_v25 = vcombine.high %v4239_v29, %v4242_v47 }
 0x659   : > { %v3146_v41 = vpop.f32.mrf.mxu1  ;;  %v3152_v61 = vpop.f32.mrf.mxu0 }
 0x65b   : > { %v2224_v0 = vpop.f32.mrf.mxu1  ;;  %v2270_v1 = vpop.f32.mrf.mxu0 }
 0x65d   : > { %v3147_v3 = vpop.f32.mrf.mxu1  ;;  %v3153_v4 = vpop.f32.mrf.mxu0 }
 0x682   : > { %v2313_v5 = vpop.f32.mrf.mxu1 }
 0x683   : > { %v2433_v6 = vcombine.low %v2221_v46, %v2313_v5  ;;  %v2434_v7 = vcombine.high %v2221_v46, %v2313_v5  ;;  %v2359_v10 = vpop.f32.mrf.mxu0 }
 0x684   : > { %v2449_v11 = vcombine.low %v2267_v59, %v2359_v10  ;;  %v2450_v16 = vcombine.high %v2267_v59, %v2359_v10  ;;  %v3158_v12 = vpop.f32.mrf.mxu1 }
 0x685   : > { %v2441_v38 = vrot.slane %v2433_v6, %v3907_v58  ;;  %v2448_v13 = vrot.slane %v2434_v7, %v3907_v58  ;;  %v3164_v36 = vpop.f32.mrf.mxu0 }
 0x686   : > { %v2457_v62 = vrot.slane %v2449_v11, %v3907_v58  ;;  %v2464_v63 = vrot.slane %v2450_v16, %v3907_v58  ;;  %v2316_v18 = vpop.f32.mrf.mxu1 }
 0x687   : > { %v2362_v19 = vpop.f32.mrf.mxu0 }
 0x688   : > { %v2465_v20 = vcombine.low %v2441_v38, %v2457_v62  ;;  %v2466_v21 = vcombine.high %v2441_v38, %v2457_v62  ;;  %v2481_v44 = vcombine.low %v2448_v13, %v2464_v63  ;;  %v2482_v22 = vcombine.high %v2448_v13, %v2464_v63  ;;  %v3159_v43 = vpop.f32.mrf.mxu1 }
 0x689   : > { %v3165_v23 = vpop.f32.mrf.mxu0 }
 0x68a   : > { %v2473_v39 = vrot.slane %v2465_v20, %v3917_v2  ;;  %v2480_v24 = vrot.slane %v2466_v21, %v3917_v2  ;;  %v2489_v31 = vrot.slane %v2481_v44, %v3917_v2  ;;  %v2496_v8 = vrot.slane %v2482_v22, %v3917_v2 }
 0x68c   : > { %v2569_v9 = vcombine.low %v2473_v39, %v2480_v24  ;;  %v3008_v32 = vcombine.high %v2473_v39, %v2480_v24  ;;  %v2585_v45 = vcombine.low %v2489_v31, %v2496_v8  ;;  %v3009_v33 = vcombine.high %v2489_v31, %v2496_v8 }
 0x68e   : > { %v2576_v14 = vrot.slane %v2569_v9, %v3907_v58  ;;  %v2584_v15 = vrot.slane %v3008_v32, %v3907_v58  ;;  %v2592_v27 = vrot.slane %v2585_v45, %v3907_v58  ;;  %v2600_v35 = vrot.slane %v3009_v33, %v3907_v58 }
 0x690   : > { %v2602_v37 = vcombine.high %v2576_v14, %v2584_v15  ;;  %v2618_v40 = vcombine.high %v2592_v27, %v2600_v35  ;;  %v2601_v28 = vcombine.low %v2576_v14, %v2584_v15  ;;  %v2617_v30 = vcombine.low %v2592_v27, %v2600_v35 }
 0x692   : > { %v2616_v53 = vrot.slane %v2602_v37, %v3917_v2  ;;  %v2632_v42 = vrot.slane %v2618_v40, %v3917_v2  ;;  %v2609_v49 = vrot.slane %v2601_v28, %v3917_v2  ;;  %v2625_v50 = vrot.slane %v2617_v30, %v3917_v2 }
 0x694   : > { %v2635_v52 = vcombine.low %v2616_v53, %v2632_v42  ;;  %v2634_v54 = vcombine.high %v2609_v49, %v2625_v50  ;;  %v2633_v58 = vcombine.low %v2609_v49, %v2625_v50  ;;  %v2636_v17 = vcombine.high %v2616_v53, %v2632_v42 }
 0x696   : > { %v3286_v55 = vpack.i.bf16 %v2635_v52, %v2567_v48  ;;  %v3281_v29 = vpack.i.bf16 %v2634_v54, %v2566_v60  ;;  %v3291_v47 = vpack.i.bf16 %v2636_v17, %v2568_v25 }
 0x698   : > { %3287 = vrot.lane.b32.xlu1 %v3286_v55, %s3583_s19  ;;  %3282 = vrot.lane.b32.xlu0 %v3281_v29, %s3584_s16 }
 0x69c   : > { %3292 = vrot.lane.b32.xlu0 %v3291_v47, %s3585_s26 }
 0x70a   : > { %v3288_v46 = vpop.permute.xlu1 %3287  ;;  %v3283_v59 = vpop.permute.xlu0 %3282 }
 0x70b   : > { %v3285_v41 = vunpack.i.h.bf16 %v3283_v59  ;;  %v3284_v61 = vunpack.i.l.bf16 %v3283_v59  ;;  %v3290_v2 = vunpack.i.h.bf16 %v3288_v46  ;;  %v3289_v0 = vunpack.i.l.bf16 %v3288_v46 }
 0x70d   : > { %v2661_v48 = vsel %vm1507_vm3, %v2565_v34, %v3284_v61  ;;  %v2662_v60 = vsel %vm1507_vm3, %v2633_v58, %v3285_v41 }
 0x70e   : > { %v3293_v25 = vpop.permute.xlu0 %3292  ;;  %v2664_v4 = vsel %vm2663_vm5, %v2661_v48, %v3289_v0  ;;  %v2665_v5 = vsel %vm2663_vm5, %v2662_v60, %v3290_v2 }
 0x70f   : > { %v3295_v1 = vunpack.i.h.bf16 %v3293_v25  ;;  %v3294_v3 = vunpack.i.l.bf16 %v3293_v25 }
 0x711   : > { %v2667_v6 = vsel %vm2666_vm6, %v2664_v4, %v3294_v3  ;;  %v2668_v7 = vsel %vm2666_vm6, %v2665_v5, %v3295_v1 }
 0x712   : > { %v2669_v10 = vpack.c.bf16 %v2668_v7, %v2667_v6 }
 0x714   : > { %3171 = vmatmul.mubr.msk.bf16.vlgmr.msra.gmra.mxu1 %vm493_vm1, %v2669_v10 }
 0x715   : > { %3461 = shalt.err (!%p3458_p6)
}
 0x716   : > { %s3462_s24 = scalar_lea.hbm %s4289_s7, 1024  ;;  %s3466_s17 = scalar_lea.hbm %s4371_s8, 2048 }
 0x717   : > { %p3463_p4 = scmp.ne.s32.totalorder %s4289_s7, %s3462_s24  ;;  %p3467_p9 = scmp.lt.s32.totalorder %s4289_s7, %s4371_s8 }
 0x718   : > { %p3468_p7 = scmp.lt.s32.totalorder %s3466_s17, %s3462_s24 }
 0x719   : > { %p3464_p12 = pnand %p3463_p4, %p4403_p11 }
 0x71a   : > { %p3469_p8 = por %p3468_p7, %p3467_p9 }
 0x71b   : > { %p3465_p13 = pneg %p3464_p12 }
 0x71d   : > { %p3470_p5 = pnand %p3469_p8, %p3465_p13 }
 0x71f   : > { %3473 = shalt.err (!%p3470_p5)
}
 0x720   : > { %s3587_s26 = smov 128   ;;  %v3010_v56 = vld [vmem:[%s478_s14] ss:$0 sm:$0xff]  ;;  %v3336_v16 = vld [vmem:[#allocation10] sm:$0xff]  ;;  %s3588_s22 = smov [#allocation10]  }
 0x721   : > { %3186 = dma.vmem_to_hbm [thread:$0]  (%p4403_p11), %s4291_s11, 1024, %s4289_s7, %s2742_s15, %s3587_s26, %s3587_s26, %s3584_s16   ;;  %v3337_v62 = vld [vmem:[#allocation10 + $0x8] sm:$0xff] }
 0x722   : > { %s2755_s18 = sshll.u32 %s3588_s22, 4  ;;  %p4404_p2 = scmp.eq.s32.totalorder %s3711_s21, 1  ;;  %s2756_s18 = int_to_ptr.vmem [resolvable:$true] %s2755_s18 }
 0x723   : > { %s3474_s27 = scalar_lea.vmem %s2756_s18, 256  ;;  %p3481_p1 = scmp.lt.s32.totalorder %s2756_s18, %s2756_s18 }
 0x724   : > { %p3475_p11 = scmp.ne.s32.totalorder %s2756_s18, %s3474_s27  ;;  %p3482_p3 = scmp.lt.s32.totalorder %s3474_s27, %s3474_s27 }
 0x726   : > { %p3476_p10 = pnand %p3475_p11, %p4404_p2  ;;  %p3483_p6 = por %p3482_p3, %p3481_p1 }
 0x728   : > { %p3477_p0 = pneg %p3476_p10 }
 0x72a   : > { %p3484_p4 = pnand %p3483_p6, %p3477_p0 }
 0x7d4   : > { %v2730_v57 = vpop.f32.mrf.mxu1 }
 0x7d5   : > { %v2731_v34 = vadd.f32 %v3010_v56, %v2730_v57 }
 0x7d6   : > { %v3172_v11 = vpop.f32.mrf.mxu1 }
 0x7d7   : > { %v2737_v12 = vadd.f32 %v3336_v16, %v2731_v34 }
 0x7d8   : > { %v2733_v38 = vpop.f32.mrf.mxu1 }
 0x7d9   : > { %2739 = vst.msk [vmem:[#allocation10] sm:$0xff] %vm493_vm1, %v2737_v12  ;;  %v2734_v13 = vadd.f32 %v3010_v56, %v2733_v38 }
 0x7da   : > { %v3173_v36 = vpop.f32.mrf.mxu1 }
 0x7db   : > { %v2738_v63 = vadd.f32 %v3337_v62, %v2734_v13 }
 0x7dd   : > { %2740 = vst.msk [vmem:[#allocation10 + $0x8] sm:$0xff] %vm493_vm1, %v2738_v63 }
 0x7de   : > { %3487 = shalt.err (!%p3484_p4)
}
 0x7df   : > { %p4405_p12 = pmov %p4404_p2  ;;  %s4406_s11 = sld [smem:[#allocation26_spill]] }
 0x7e0   : > { %p4407_p13 = pmov %p4404_p2 }
 0x7e5   : > { %3185 = dma.vmem_to_hbm [thread:$0]  (%p4405_p12), %s2756_s18, 256, %s4406_s11, [#allocation4], %s3587_s26, %s3587_s26, %s3584_s16  }
 0x7e6   : > { %3535 = dma.done.wait (%p4407_p13), [#allocation4], 256   ;;  %p4408_p9 = pmov %p4404_p2 }
 0x7e8   : > { %3537 = vsyncadd (%p4408_p9), [#allocation4], 4294967040 }
 0x7e9 PF: > { %s4409_s7 = sld [smem:[#allocation18_spill]] }
 0x7ea   : > { %s4410_s15 = sld [smem:[#allocation23_spill]] }
 0x7eb   : > { %s4411_s3 = sld [smem:[#allocation20_spill]] }
 0x7ef   : > { %s2793_s12 = sand.u32 1, %s4409_s7  }
 0x7f0   : > { %p4412_p7 = scmp.ne.s32.totalorder %s4410_s15, 0  ;;  %s2794_s23 = scalar_lea.sflag [#allocation12], %s2793_s12 }
 0x7f1   : > { %p4413_p8 = scmp.ge.s32.totalorder %s4411_s3, 2 }
 0x7f3   : > { %p3205_p5 = pnand %p4413_p8, %p4412_p7 }
 0x7f5   : > { %p3206_p11 = pneg %p3205_p5 }
 0x7f7   : > { %3539 = dma.done.wait (%p3206_p11), %s2794_s23, 1024  }
 0x7f8   : > { %3541 = vsyncadd (%p3206_p11), %s2794_s23, 4294966272  ;;  %s30_s10 = sadd.s32 1, %s4411_s3   ;;  %s4414_s16 = sld [smem:[#allocation19_spill]] }
 0x7f9   : > { %p27_p2 = scmp.ge.s32.totalorder %s30_s10, 4   ;;  %s4415_s29 = sld [smem:[#allocation22_spill]] }
 0x7fa   : > { %s4416_s21 = sld [smem:[#allocation21_spill]]  ;;  %s4417_s27 = smov %s3548_s28 }
 0x7fb   : > { %s4419_s30 = smov %s3560_s9 }
 0x7fc   :  { %29 = sbr.rel (!%p27_p2) target bundleno = 14 (0xe), region = 146 }
 0x7fe   : > { %s4418_s28 = smov %s4414_s16 }
 0x800   : > { %s4420_s9 = smov %s4416_s21 }
 0x801   :  { %2799 = vsyncpa [#allocation3], 1 }
 0x802   :  { %2801 = vsyncpa [#allocation3 + $0x1], 1 }
 0x803   :  { %2802 = vsyncpa [#allocation6], 1 }
 0x804   :  { %2804 = vsyncpa [#allocation6 + $0x1], 1 }
 0x805   :  { %2805 = vsyncpa [#allocation9], 1 }
 0x806   :  { %2807 = vsyncpa [#allocation9 + $0x1], 1 }
 0x807   :  { %2808 = vsyncpa [#allocation4], 1 }
 0x808   :  { %2810 = vsyncpa [#allocation4 + $0x1], 1 }
 0x809   :  { %2811 = vsyncpa [#allocation12], 1 }
 0x80a   :  { %2813 = vsyncpa [#allocation12 + $0x1], 1 }

</bundles_post_ra>
